<compile_context>
chip_gen: v7x
topology: tpu7x:2x2x1
jax: 0.10.0
libtpu: 0.0.40
codegen_flags: <defaults>
</compile_context>

<pallas_src>
import functools

import jax
import jax.numpy as jnp
from jax.experimental import pallas as pl
from jax.experimental.pallas import tpu as pltpu


def _round_up(x, m):
    return (x + m - 1) // m * m


# ----------------------------------------------------------------------------
# Fused forward kernel: whole (small) graph + all params fit in VMEM, so we run
# a single grid point and keep the k-hop loop inside the kernel.
# ----------------------------------------------------------------------------
def dagnn_kernel(feats_ref, w1_ref, b1_ref, w2_ref, b2_ref, adj_ref,
                 norm_col_ref, norm_row_ref, s_ref, o_ref, hops_ref, *, k):
    # ---- MLP layer 1: relu(x @ W1 + b1) ----
    h = jnp.dot(feats_ref[...], w1_ref[...], preferred_element_type=jnp.float32)
    h = jnp.maximum(h + b1_ref[...], 0.0)
    # ---- MLP layer 2: h @ W2 + b2 (no activation) ----
    h = jnp.dot(h, w2_ref[...], preferred_element_type=jnp.float32) + b2_ref[...]

    # ---- fold symmetric normalization into adjacency once (single VPU op) ----
    # a_hat[i, j] = norm[i] * adj[i, j] * norm[j]
    a_hat = adj_ref[...] * norm_col_ref[...] * norm_row_ref[...]   # [N, N]

    # ---- k propagation hops, back-to-back MXU matmuls; stash every hop ----
    hops_ref[0] = h
    f = h
    for i in range(k):                      # small static k: unrolled on purpose
        f = jnp.dot(a_hat, f, preferred_element_type=jnp.float32)
        hops_ref[i + 1] = f

    # ---- batched hop-attention readout (VPU reduction + EUP sigmoid) ----
    # DAGNNConv: S = sigmoid(H @ s); out[n, d] = sum_i S[n, i] * H[n, i, d]
    hops = hops_ref[...]                    # [k+1, N, D]
    s_row = s_ref[...]                      # [1, D]
    gates = jax.nn.sigmoid(
        jnp.sum(hops * s_row, axis=-1, keepdims=True))             # [k+1, N, 1]
    o_ref[...] = jnp.sum(gates * hops, axis=0)                      # [N, D]


def dagnn_forward(feats, w1, b1, w2, b2, adj, norm, s, *, k):
    n, in_dim = feats.shape
    hid_dim = w1.shape[1]
    out_dim = w2.shape[1]

    # Pad everything to lane-dense shapes (multiples of 128); padded rows/cols
    # are zero so they contribute nothing and are sliced away at the end.
    n_p = _round_up(n, 128)
    in_p = _round_up(in_dim, 128)
    hid_p = _round_up(hid_dim, 128)
    out_p = _round_up(out_dim, 128)

    def pad2(x, r, c):
        return jnp.pad(x, ((0, r - x.shape[0]), (0, c - x.shape[1])))

    feats_p = pad2(feats, n_p, in_p)
    w1_p = pad2(w1, in_p, hid_p)
    b1_p = pad2(b1, 1, hid_p)
    w2_p = pad2(w2, hid_p, out_p)
    b2_p = pad2(b2, 1, out_p)
    adj_p = pad2(adj, n_p, n_p)
    norm_col = pad2(norm, n_p, 1)           # [N, 1]  (padded entries = 0)
    norm_row = pad2(norm.T, 1, n_p)         # [1, N]
    s_row = pad2(s.T, 1, out_p)             # [1, D]

    vmem = pl.BlockSpec(memory_space=pltpu.MemorySpace.VMEM)
    out_padded = pl.pallas_call(
        functools.partial(dagnn_kernel, k=k),
        out_shape=jax.ShapeDtypeStruct((n_p, out_p), jnp.float32),
        in_specs=[vmem] * 9,
        out_specs=vmem,
        scratch_shapes=[pltpu.VMEM((k + 1, n_p, out_p), jnp.float32)],
    )(feats_p, w1_p, b1_p, w2_p, b2_p, adj_p, norm_col, norm_row, s_row)
    return out_padded[:n, :out_dim]


# ----------------------------------------------------------------------------
# Deterministic parameter init (mirrors torch xavier_uniform_ / zeros_)
# ----------------------------------------------------------------------------
def xavier_uniform(key, shape, gain):
    # torch 2-D convention: fan_out = shape[0], fan_in = shape[1]
    fan_out, fan_in = shape
    bound = gain * jnp.sqrt(6.0 / (fan_in + fan_out))
    return jax.random.uniform(key, shape, jnp.float32, minval=-bound, maxval=bound)


# ----------------------------------------------------------------------------
# Pure-JAX reference for correctness checking (unpadded)
# ----------------------------------------------------------------------------
def dagnn_ref(feats, w1, b1, w2, b2, adj, norm, s, *, k):
    h = jnp.maximum(feats @ w1 + b1, 0.0)
    h = h @ w2 + b2
    results = [h]
    f = h
    for _ in range(k):
        f = f * norm
        f = adj @ f
        f = f * norm
        results.append(f)
    H = jnp.stack(results, axis=1)                     # [N, k+1, D]
    S = jax.nn.sigmoid(H @ s)                          # [N, k+1, 1]
    S = jnp.transpose(S, (0, 2, 1))                    # [N, 1, k+1]
    return jnp.squeeze(S @ H, axis=1)                  # [N, D]


if __name__ == "__main__":
    key = jax.random.PRNGKey(0)
    k_hops, N, in_dim, hid_dim, out_dim = 4, 64, 16, 32, 16

    keys = jax.random.split(key, 5)

    # Input node features
    feats = jax.random.normal(keys[0], (N, in_dim), jnp.float32)

    # MLP params (stored transposed: [in, out]); xavier gains match PyTorch
    relu_gain = jnp.sqrt(2.0)      # calculate_gain('relu')
    sigm_gain = 1.0                # calculate_gain('sigmoid')
    w1 = xavier_uniform(keys[1], (hid_dim, in_dim), relu_gain).T    # [in, hid]
    b1 = jnp.zeros((1, hid_dim), jnp.float32)
    w2 = xavier_uniform(keys[2], (out_dim, hid_dim), 1.0).T         # [hid, out]
    b2 = jnp.zeros((1, out_dim), jnp.float32)
    s = xavier_uniform(keys[3], (out_dim, 1), sigm_gain)            # [out, 1]

    # Deterministic graph: symmetric random edges + ring (guarantees deg > 0)
    rand = jax.random.bernoulli(keys[4], 0.08, (N, N)).astype(jnp.float32)
    adj = jnp.maximum(rand, rand.T)
    ring = (jnp.eye(N, k=1) + jnp.eye(N, k=-1)
            + jnp.eye(N, k=N - 1) + jnp.eye(N, k=-(N - 1))).astype(jnp.float32)
    adj = jnp.minimum(adj + ring, 1.0)
    adj = adj * (1.0 - jnp.eye(N, dtype=jnp.float32))   # no self loops

    degs = adj.sum(axis=1)                               # in-degrees
    norm = (degs ** -0.5).reshape(N, 1)                  # deg^-0.5, [N, 1]

    out = dagnn_forward(feats, w1, b1, w2, b2, adj, norm, s, k=k_hops)
    out = jax.block_until_ready(out)

    ref = dagnn_ref(feats, w1, b1, w2, b2, adj, norm, s, k=k_hops)
    assert out.shape == (N, out_dim)
    assert jnp.allclose(out, ref, atol=1e-4, rtol=1e-4), "mismatch vs reference"

    print("KERNEL_OK")
</pallas_src>

<mosaic_0001>
module attributes {stable_mosaic.version = 11 : i64} {
  func.func @dagnn_kernel(%arg0: memref<128x128xf32, #tpu.memory_space<vmem>>, %arg1: memref<128x128xf32, #tpu.memory_space<vmem>>, %arg2: memref<1x128xf32, #tpu.memory_space<vmem>>, %arg3: memref<128x128xf32, #tpu.memory_space<vmem>>, %arg4: memref<1x128xf32, #tpu.memory_space<vmem>>, %arg5: memref<128x128xf32, #tpu.memory_space<vmem>>, %arg6: memref<128x1xf32, #tpu.memory_space<vmem>>, %arg7: memref<1x128xf32, #tpu.memory_space<vmem>>, %arg8: memref<1x128xf32, #tpu.memory_space<vmem>>, %arg9: memref<128x128xf32, #tpu.memory_space<vmem>>, %arg10: memref<5x128x128xf32, #tpu.memory_space<vmem>>) attributes {dimension_semantics = [], scalar_prefetch = 0 : i64, scratch_operands = 1 : i64, tpu.core_type = #tpu.core_type<tc>} {
    %c0 = arith.constant 0 : index
    %c0_0 = arith.constant 0 : index
    %0 = vector.load %arg0[%c0, %c0_0] : memref<128x128xf32, #tpu.memory_space<vmem>>, vector<128x128xf32>
    %c0_1 = arith.constant 0 : index
    %c0_2 = arith.constant 0 : index
    %1 = vector.load %arg1[%c0_1, %c0_2] : memref<128x128xf32, #tpu.memory_space<vmem>>, vector<128x128xf32>
    %cst = arith.constant dense<0.000000e+00> : vector<128x128xf32>
    %2 = tpu.matmul %0, %1, %cst {dimension_numbers = #tpu.dot_dimension_numbers<[1], [0], [0], [1], [0, 0, 1, 1], [], []>} : vector<128x128xf32>, vector<128x128xf32>, vector<128x128xf32> -> vector<128x128xf32>
    %c0_3 = arith.constant 0 : index
    %c0_4 = arith.constant 0 : index
    %3 = vector.load %arg2[%c0_3, %c0_4] : memref<1x128xf32, #tpu.memory_space<vmem>>, vector<1x128xf32>
    %4 = vector.broadcast %3 : vector<1x128xf32> to vector<128x128xf32>
    %5 = arith.addf %2, %4 : vector<128x128xf32>
    %cst_5 = arith.constant 0.000000e+00 : f32
    %6 = vector.broadcast %cst_5 : f32 to vector<128x128xf32>
    %7 = arith.maximumf %5, %6 : vector<128x128xf32>
    %c0_6 = arith.constant 0 : index
    %c0_7 = arith.constant 0 : index
    %8 = vector.load %arg3[%c0_6, %c0_7] : memref<128x128xf32, #tpu.memory_space<vmem>>, vector<128x128xf32>
    %cst_8 = arith.constant dense<0.000000e+00> : vector<128x128xf32>
    %9 = tpu.matmul %7, %8, %cst_8 {dimension_numbers = #tpu.dot_dimension_numbers<[1], [0], [0], [1], [0, 0, 1, 1], [], []>} : vector<128x128xf32>, vector<128x128xf32>, vector<128x128xf32> -> vector<128x128xf32>
    %c0_9 = arith.constant 0 : index
    %c0_10 = arith.constant 0 : index
    %10 = vector.load %arg4[%c0_9, %c0_10] : memref<1x128xf32, #tpu.memory_space<vmem>>, vector<1x128xf32>
    %11 = vector.broadcast %10 : vector<1x128xf32> to vector<128x128xf32>
    %12 = arith.addf %9, %11 : vector<128x128xf32>
    %c0_11 = arith.constant 0 : index
    %c0_12 = arith.constant 0 : index
    %13 = vector.load %arg5[%c0_11, %c0_12] : memref<128x128xf32, #tpu.memory_space<vmem>>, vector<128x128xf32>
    %c0_13 = arith.constant 0 : index
    %c0_14 = arith.constant 0 : index
    %14 = vector.load %arg6[%c0_13, %c0_14] : memref<128x1xf32, #tpu.memory_space<vmem>>, vector<128x1xf32>
    %15 = vector.broadcast %14 : vector<128x1xf32> to vector<128x128xf32>
    %16 = arith.mulf %13, %15 : vector<128x128xf32>
    %c0_15 = arith.constant 0 : index
    %c0_16 = arith.constant 0 : index
    %17 = vector.load %arg7[%c0_15, %c0_16] : memref<1x128xf32, #tpu.memory_space<vmem>>, vector<1x128xf32>
    %18 = vector.broadcast %17 : vector<1x128xf32> to vector<128x128xf32>
    %19 = arith.mulf %16, %18 : vector<128x128xf32>
    %c0_17 = arith.constant 0 : index
    %c0_18 = arith.constant 0 : index
    %c0_19 = arith.constant 0 : index
    %20 = vector.load %arg10[%c0_17, %c0_18, %c0_19] : memref<5x128x128xf32, #tpu.memory_space<vmem>>, vector<1x128x128xf32>
    %21 = vector.shape_cast %20 : vector<1x128x128xf32> to vector<128x128xf32>
    %22 = vector.shape_cast %12 : vector<128x128xf32> to vector<1x128x128xf32>
    tpu.vector_store %arg10[%c0_17, %c0_18, %c0_19], %22 {strides = array<i32>} : memref<5x128x128xf32, #tpu.memory_space<vmem>>, vector<1x128x128xf32>,
    %cst_20 = arith.constant dense<0.000000e+00> : vector<128x128xf32>
    %23 = tpu.matmul %19, %12, %cst_20 {dimension_numbers = #tpu.dot_dimension_numbers<[1], [0], [0], [1], [0, 0, 1, 1], [], []>} : vector<128x128xf32>, vector<128x128xf32>, vector<128x128xf32> -> vector<128x128xf32>
    %c1 = arith.constant 1 : index
    %c0_21 = arith.constant 0 : index
    %c0_22 = arith.constant 0 : index
    %24 = vector.load %arg10[%c1, %c0_21, %c0_22] : memref<5x128x128xf32, #tpu.memory_space<vmem>>, vector<1x128x128xf32>
    %25 = vector.shape_cast %24 : vector<1x128x128xf32> to vector<128x128xf32>
    %26 = vector.shape_cast %23 : vector<128x128xf32> to vector<1x128x128xf32>
    tpu.vector_store %arg10[%c1, %c0_21, %c0_22], %26 {strides = array<i32>} : memref<5x128x128xf32, #tpu.memory_space<vmem>>, vector<1x128x128xf32>,
    %cst_23 = arith.constant dense<0.000000e+00> : vector<128x128xf32>
    %27 = tpu.matmul %19, %23, %cst_23 {dimension_numbers = #tpu.dot_dimension_numbers<[1], [0], [0], [1], [0, 0, 1, 1], [], []>} : vector<128x128xf32>, vector<128x128xf32>, vector<128x128xf32> -> vector<128x128xf32>
    %c2 = arith.constant 2 : index
    %c0_24 = arith.constant 0 : index
    %c0_25 = arith.constant 0 : index
    %28 = vector.load %arg10[%c2, %c0_24, %c0_25] : memref<5x128x128xf32, #tpu.memory_space<vmem>>, vector<1x128x128xf32>
    %29 = vector.shape_cast %28 : vector<1x128x128xf32> to vector<128x128xf32>
    %30 = vector.shape_cast %27 : vector<128x128xf32> to vector<1x128x128xf32>
    tpu.vector_store %arg10[%c2, %c0_24, %c0_25], %30 {strides = array<i32>} : memref<5x128x128xf32, #tpu.memory_space<vmem>>, vector<1x128x128xf32>,
    %cst_26 = arith.constant dense<0.000000e+00> : vector<128x128xf32>
    %31 = tpu.matmul %19, %27, %cst_26 {dimension_numbers = #tpu.dot_dimension_numbers<[1], [0], [0], [1], [0, 0, 1, 1], [], []>} : vector<128x128xf32>, vector<128x128xf32>, vector<128x128xf32> -> vector<128x128xf32>
    %c3 = arith.constant 3 : index
    %c0_27 = arith.constant 0 : index
    %c0_28 = arith.constant 0 : index
    %32 = vector.load %arg10[%c3, %c0_27, %c0_28] : memref<5x128x128xf32, #tpu.memory_space<vmem>>, vector<1x128x128xf32>
    %33 = vector.shape_cast %32 : vector<1x128x128xf32> to vector<128x128xf32>
    %34 = vector.shape_cast %31 : vector<128x128xf32> to vector<1x128x128xf32>
    tpu.vector_store %arg10[%c3, %c0_27, %c0_28], %34 {strides = array<i32>} : memref<5x128x128xf32, #tpu.memory_space<vmem>>, vector<1x128x128xf32>,
    %cst_29 = arith.constant dense<0.000000e+00> : vector<128x128xf32>
    %35 = tpu.matmul %19, %31, %cst_29 {dimension_numbers = #tpu.dot_dimension_numbers<[1], [0], [0], [1], [0, 0, 1, 1], [], []>} : vector<128x128xf32>, vector<128x128xf32>, vector<128x128xf32> -> vector<128x128xf32>
    %c4 = arith.constant 4 : index
    %c0_30 = arith.constant 0 : index
    %c0_31 = arith.constant 0 : index
    %36 = vector.load %arg10[%c4, %c0_30, %c0_31] : memref<5x128x128xf32, #tpu.memory_space<vmem>>, vector<1x128x128xf32>
    %37 = vector.shape_cast %36 : vector<1x128x128xf32> to vector<128x128xf32>
    %38 = vector.shape_cast %35 : vector<128x128xf32> to vector<1x128x128xf32>
    tpu.vector_store %arg10[%c4, %c0_30, %c0_31], %38 {strides = array<i32>} : memref<5x128x128xf32, #tpu.memory_space<vmem>>, vector<1x128x128xf32>,
    %c0_32 = arith.constant 0 : index
    %c0_33 = arith.constant 0 : index
    %c0_34 = arith.constant 0 : index
    %39 = vector.load %arg10[%c0_32, %c0_33, %c0_34] : memref<5x128x128xf32, #tpu.memory_space<vmem>>, vector<5x128x128xf32>
    %c0_35 = arith.constant 0 : index
    %c0_36 = arith.constant 0 : index
    %40 = vector.load %arg8[%c0_35, %c0_36] : memref<1x128xf32, #tpu.memory_space<vmem>>, vector<1x128xf32>
    %41 = vector.shape_cast %40 : vector<1x128xf32> to vector<1x1x128xf32>
    %42 = vector.broadcast %41 : vector<1x1x128xf32> to vector<5x128x128xf32>
    %43 = arith.mulf %39, %42 : vector<5x128x128xf32>
    %cst_37 = arith.constant dense<0.000000e+00> : vector<5x128xf32>
    %44 = vector.multi_reduction <add>, %43, %cst_37 [2] : vector<5x128x128xf32> to vector<5x128xf32>
    %45 = vector.shape_cast %44 : vector<5x128xf32> to vector<5x128x1xf32>
    %46 = arith.negf %45 : vector<5x128x1xf32>
    %47 = math.exp %46 : vector<5x128x1xf32>
    %cst_38 = arith.constant 1.000000e+00 : f32
    %48 = vector.broadcast %cst_38 : f32 to vector<5x128x1xf32>
    %49 = arith.addf %48, %47 : vector<5x128x1xf32>
    %50 = arith.divf %48, %49 : vector<5x128x1xf32>
    %51 = vector.broadcast %50 : vector<5x128x1xf32> to vector<5x128x128xf32>
    %52 = arith.mulf %51, %39 : vector<5x128x128xf32>
    %cst_39 = arith.constant dense<0.000000e+00> : vector<128x128xf32>
    %53 = vector.multi_reduction <add>, %52, %cst_39 [0] : vector<5x128x128xf32> to vector<128x128xf32>
    %c0_40 = arith.constant 0 : index
    %c0_41 = arith.constant 0 : index
    %54 = vector.load %arg9[%c0_40, %c0_41] : memref<128x128xf32, #tpu.memory_space<vmem>>, vector<128x128xf32>
    tpu.vector_store %arg9[%c0_40, %c0_41], %53 {strides = array<i32>} : memref<128x128xf32, #tpu.memory_space<vmem>>, vector<128x128xf32>,
    return
  }
}

</mosaic_0001>

<bundles_post_ra>
// kernel: tpu_custom_call.1
= control target key start
LH: loop header
LB: loop body
LE: loop exit
PB: predicated region body
PF: predicated region fallthrough
CT: control target
= control target key end

     0   :  { %14 = vsyncpa [#allocation4], 0  ;;  %s4485_s0 = inlined_call_operand.vmem [shape: f32[128,128], index: 0, kind: input, shape index: {}]   ;;  %s4486_s1 = inlined_call_operand.hbm [shape: f32[128,128], index: 1, kind: input, shape index: {}]   ;;  %s4487_s2 = inlined_call_operand.vmem [shape: f32[1,128], index: 2, kind: input, shape index: {}]   ;;  %s4488_s3 = inlined_call_operand.hbm [shape: f32[128,128], index: 3, kind: input, shape index: {}]   ;;  %s4489_s4 = inlined_call_operand.vmem [shape: f32[1,128], index: 4, kind: input, shape index: {}]   ;;  %s4490_s5 = inlined_call_operand.hbm [shape: f32[128,128], index: 5, kind: input, shape index: {}]   ;;  %s4491_s6 = inlined_call_operand.vmem [shape: f32[128,1], index: 6, kind: input, shape index: {}]   ;;  %s4492_s7 = inlined_call_operand.vmem [shape: f32[1,128], index: 7, kind: input, shape index: {}]   ;;  %s4493_s8 = inlined_call_operand.vmem [shape: f32[1,128], index: 8, kind: input, shape index: {}]   ;;  %s4494_s9 = inlined_call_operand.hbm [shape: f32[128,128], index: 9, kind: output, shape index: {}]  }
   0x1   :  { %15 = vsyncpa [#allocation7], 0 }
   0x2   :  { %16 = vsyncpa [#allocation5], 0  ;;  %s3471_s30 = smov [#allocation6]   ;;  %s3472_s11 = smov [#allocation3]  }
   0x3   :  { %s38_s10 = sshll.u32 %s3471_s30, 4  ;;  %s24_s12 = sshll.u32 %s3472_s11, 4  ;;  %s39_s10 = int_to_ptr.vmem [resolvable:$true] %s38_s10  ;;  %s3528_s12 = int_to_ptr.vmem [resolvable:$true] %s24_s12 }
   0x4   :  { %s3377_s15 = scalar_lea.hbm %s4488_s3, 2048 }
   0x5   :  { %p3378_p0 = scmp.ne.s32.totalorder %s4488_s3, %s3377_s15  ;;  %p3381_p1 = scmp.lt.u32.totalorder %s3377_s15, %s4488_s3 }
   0x7   :  { %p3383_p2 = pnand %p3381_p1, %p3378_p0 }
   0x9   :  { %3386 = shalt.err (!%p3383_p2)
}
   0xa   :  { %s3387_s20 = scalar_lea.vmem %s39_s10, 2048  ;;  %p3392_p4 = scmp.lt.s32.totalorder %s39_s10, %s39_s10 }
   0xb   :  { %p3388_p3 = scmp.ne.s32.totalorder %s39_s10, %s3387_s20  ;;  %p3393_p5 = scmp.lt.s32.totalorder %s3387_s20, %s3387_s20 }
   0xd   :  { %p3394_p6 = por %p3393_p5, %p3392_p4 }
   0xf   :  { %p3395_p7 = pnand %p3394_p6, %p3388_p3 }
  0x11   :  { %3398 = shalt.err (!%p3395_p7)
}
  0x12   :  { %s3473_s21 = smov 128   ;;  %s3474_s22 = smov 8  }
  0x13   :  { %44 = dma.hbm_to_vmem [thread:$0]  %s4488_s3, 2048, %s39_s10, [#allocation7], %s3473_s21, %s3473_s21, %s3474_s22  }
  0x14   :  { %s3399_s27 = scalar_lea.hbm %s4486_s1, 2048 }
  0x15   :  { %p3400_p8 = scmp.ne.s32.totalorder %s4486_s1, %s3399_s27  ;;  %p3403_p9 = scmp.lt.u32.totalorder %s3399_s27, %s4486_s1 }
  0x17   :  { %p3405_p10 = pnand %p3403_p9, %p3400_p8 }
  0x19   :  { %3408 = shalt.err (!%p3405_p10)
}
  0x1a   :  { %s3409_s13 = scalar_lea.vmem %s3528_s12, 2048  ;;  %p3414_p12 = scmp.lt.s32.totalorder %s3528_s12, %s3528_s12 }
  0x1b   :  { %p3410_p11 = scmp.ne.s32.totalorder %s3528_s12, %s3409_s13  ;;  %p3415_p13 = scmp.lt.s32.totalorder %s3409_s13, %s3409_s13 }
  0x1d   :  { %p3416_p0 = por %p3415_p13, %p3414_p12 }
  0x1f   :  { %p3417_p1 = pnand %p3416_p0, %p3410_p11 }
  0x21   :  { %3420 = shalt.err (!%p3417_p1)
}
  0x22   :  { %30 = dma.hbm_to_vmem [thread:$0]  %s4486_s1, 2048, %s3528_s12, [#allocation4], %s3473_s21, %s3473_s21, %s3474_s22  }
  0x23   :  { %s3475_s14 = smov [#allocation8]   ;;  %s3421_s18 = scalar_lea.hbm %s4490_s5, 2048 }
  0x24   :  { %s52_s15 = sshll.u32 %s3475_s14, 4  ;;  %p3422_p2 = scmp.ne.s32.totalorder %s4490_s5, %s3421_s18  ;;  %s53_s15 = int_to_ptr.vmem [resolvable:$true] %s52_s15 }
  0x25   :  { %p3425_p3 = scmp.lt.u32.totalorder %s3421_s18, %s4490_s5 }
  0x27   :  { %p3427_p4 = pnand %p3425_p3, %p3422_p2 }
  0x29   :  { %3430 = shalt.err (!%p3427_p4)
}
  0x2a   :  { %s3431_s25 = scalar_lea.vmem %s53_s15, 2048  ;;  %p3436_p6 = scmp.lt.s32.totalorder %s53_s15, %s53_s15 }
  0x2b   :  { %p3432_p5 = scmp.ne.s32.totalorder %s53_s15, %s3431_s25  ;;  %p3437_p7 = scmp.lt.s32.totalorder %s3431_s25, %s3431_s25 }
  0x2d   :  { %p3438_p8 = por %p3437_p7, %p3436_p6 }
  0x2f   :  { %p3439_p9 = pnand %p3438_p8, %p3432_p5 }
  0x31   :  { %3442 = shalt.err (!%p3439_p9)
}
  0x32   :  { %58 = dma.hbm_to_vmem [thread:$0]  %s4490_s5, 2048, %s53_s15, [#allocation7], %s3473_s21, %s3473_s21, %s3474_s22  }
  0x33   :  { %3465 = dma.done.wait [#allocation4], 2048  }
  0x34   :  { %3466 = vsyncadd [#allocation4], 4294965248 }
  0x35   :  { %3467 = dma.done.wait [#allocation7], 4096  }
  0x36   :  { %3468 = vsyncadd [#allocation7], 4294963200  ;;  %v90_v0 = vld [vmem:[#allocation3] sm:$0xff]  ;;  %v91_v1 = vld [vmem:[#allocation3 + $0x8] sm:$0xff] }
  0x37   :  { %v92_v2 = vld [vmem:[#allocation3 + $0x10] sm:$0xff]  ;;  %v2854_v3 = vpack.c.bf16 %v91_v1, %v90_v0  ;;  %v93_v4 = vld [vmem:[#allocation3 + $0x18] sm:$0xff]  ;;  %v94_v6 = vld [vmem:[#allocation3 + $0x20] sm:$0xff] }
  0x38   :  { %v2858_v5 = vpack.c.bf16 %v93_v4, %v92_v2  ;;  %v95_v7 = vld [vmem:[#allocation3 + $0x28] sm:$0xff]  ;;  %v74_v9 = vld [vmem:[%s4485_s0] sm:$0xff]  ;;  %v96_v10 = vld [vmem:[#allocation3 + $0x30] sm:$0xff]  ;;  %v3476_v2 = vmov 0  }
  0x39   :  { %2855 = vmatprep.subr.bf16.mxu0 %v2854_v3  ;;  %v2862_v8 = vpack.c.bf16 %v95_v7, %v94_v6  ;;  %v97_v11 = vld [vmem:[#allocation3 + $0x38] sm:$0xff]  ;;  %2550 = vmatprep.mubr.f32.mxu0 %v74_v9  ;;  %v98_v13 = vld [vmem:[#allocation3 + $0x40] sm:$0xff]  ;;  %v99_v14 = vld [vmem:[#allocation3 + $0x48] sm:$0xff] }
  0x3a   :  { %2857 = vmatpush3.bf16.msra.mxu0 %v2854_v3  ;;  %v2866_v12 = vpack.c.bf16 %v97_v11, %v96_v10  ;;  %v274_v15 = vld [vmem:[#allocation6] sm:$0xff]  ;;  %v275_v16 = vld [vmem:[#allocation6 + $0x8] sm:$0xff]  ;;  %v276_v17 = vld [vmem:[#allocation6 + $0x10] sm:$0xff]  ;;  %v2870_v21 = vpack.c.bf16 %v99_v14, %v98_v13  ;;  %3053 = vset.pattern.permute.xlu0 %v3476_v2 }
  0x3b   :  { %2859 = vmatprep.subr.bf16.mxu0 %v2858_v5  ;;  %v277_v18 = vld [vmem:[#allocation6 + $0x18] sm:$0xff]  ;;  %v2886_v19 = vpack.c.bf16 %v275_v16, %v274_v15  ;;  %v278_v22 = vld [vmem:[#allocation6 + $0x20] sm:$0xff]  ;;  %v279_v23 = vld [vmem:[#allocation6 + $0x28] sm:$0xff]  ;;  %3054 = vset.pattern.permute.xlu1 %v3476_v2 }
  0x3c   :  { %v2890_v20 = vpack.c.bf16 %v277_v18, %v276_v17  ;;  %v100_v24 = vld [vmem:[#allocation3 + $0x50] sm:$0xff]  ;;  %v101_v25 = vld [vmem:[#allocation3 + $0x58] sm:$0xff]  ;;  %v2894_v26 = vpack.c.bf16 %v279_v23, %v278_v22  ;;  %v102_v30 = vld [vmem:[#allocation3 + $0x60] sm:$0xff] }
  0x3d   :  { %2887 = vmatprep.subr.bf16.mxu1 %v2886_v19  ;;  %v2874_v27 = vpack.c.bf16 %v101_v25, %v100_v24  ;;  %v280_v28 = vld [vmem:[#allocation6 + $0x30] sm:$0xff]  ;;  %v281_v29 = vld [vmem:[#allocation6 + $0x38] sm:$0xff]  ;;  %v103_v31 = vld [vmem:[#allocation3 + $0x68] sm:$0xff] }
  0x3e   :  { %2861 = vmatpush3.bf16.msra.mxu0 %v2858_v5  ;;  %2889 = vmatpush3.bf16.msra.mxu1 %v2886_v19  ;;  %v2898_v32 = vpack.c.bf16 %v281_v29, %v280_v28  ;;  %v2878_v33 = vpack.c.bf16 %v103_v31, %v102_v30  ;;  %v282_v34 = vld [vmem:[#allocation6 + $0x40] sm:$0xff]  ;;  %v283_v35 = vld [vmem:[#allocation6 + $0x48] sm:$0xff]  ;;  %v104_v36 = vld [vmem:[#allocation3 + $0x70] sm:$0xff] }
  0x3f   :  { %2863 = vmatprep.subr.bf16.mxu0 %v2862_v8  ;;  %2891 = vmatprep.subr.bf16.mxu1 %v2890_v20  ;;  %v105_v37 = vld [vmem:[#allocation3 + $0x78] sm:$0xff]  ;;  %v2902_v38 = vpack.c.bf16 %v283_v35, %v282_v34  ;;  %v284_v40 = vld [vmem:[#allocation6 + $0x50] sm:$0xff]  ;;  %v286_v43 = vld [vmem:[#allocation6 + $0x60] sm:$0xff] }
  0x40   :  { %v2882_v39 = vpack.c.bf16 %v105_v37, %v104_v36  ;;  %v285_v41 = vld [vmem:[#allocation6 + $0x58] sm:$0xff]  ;;  %v287_v44 = vld [vmem:[#allocation6 + $0x68] sm:$0xff]  ;;  %v76_v47 = vld [vmem:[%s4485_s0 + $0x10] sm:$0xff] }
  0x41   :  { %v2906_v42 = vpack.c.bf16 %v285_v41, %v284_v40  ;;  %v75_v45 = vld [vmem:[%s4485_s0 + $0x8] sm:$0xff]  ;;  %v2910_v46 = vpack.c.bf16 %v287_v44, %v286_v43  ;;  %v77_v48 = vld [vmem:[%s4485_s0 + $0x18] sm:$0xff]  ;;  %v78_v49 = vld [vmem:[%s4485_s0 + $0x20] sm:$0xff] }
  0x42   :  { %2865 = vmatpush3.bf16.msra.mxu0 %v2862_v8  ;;  %2893 = vmatpush3.bf16.msra.mxu1 %v2890_v20  ;;  %v79_v50 = vld [vmem:[%s4485_s0 + $0x28] sm:$0xff]  ;;  %v80_v51 = vld [vmem:[%s4485_s0 + $0x30] sm:$0xff]  ;;  %v81_v52 = vld [vmem:[%s4485_s0 + $0x38] sm:$0xff] }
  0x43   :  { %2867 = vmatprep.subr.bf16.mxu0 %v2866_v12  ;;  %2895 = vmatprep.subr.bf16.mxu1 %v2894_v26  ;;  %v82_v53 = vld [vmem:[%s4485_s0 + $0x40] sm:$0xff]  ;;  %v83_v54 = vld [vmem:[%s4485_s0 + $0x48] sm:$0xff]  ;;  %v84_v55 = vld [vmem:[%s4485_s0 + $0x50] sm:$0xff] }
  0x44   :  { %v85_v56 = vld [vmem:[%s4485_s0 + $0x58] sm:$0xff]  ;;  %v86_v57 = vld [vmem:[%s4485_s0 + $0x60] sm:$0xff]  ;;  %v87_v58 = vld [vmem:[%s4485_s0 + $0x68] sm:$0xff] }
  0x45   :  { %v88_v59 = vld [vmem:[%s4485_s0 + $0x70] sm:$0xff]  ;;  %v89_v60 = vld [vmem:[%s4485_s0 + $0x78] sm:$0xff]  ;;  %v458_v0 = vld [vmem:[%s4491_s6] sm:$0xff] }
  0x46   :  { %2869 = vmatpush3.bf16.msra.mxu0 %v2866_v12  ;;  %2897 = vmatpush3.bf16.msra.mxu1 %v2894_v26  ;;  %v288_v61 = vld [vmem:[#allocation6 + $0x70] sm:$0xff]  ;;  %v289_v62 = vld [vmem:[#allocation6 + $0x78] sm:$0xff]  ;;  %v459_v3 = vld [vmem:[%s4491_s6 + $0x8] sm:$0xff] }
  0x47   :  { %2871 = vmatprep.subr.bf16.mxu0 %v2870_v21  ;;  %2899 = vmatprep.subr.bf16.mxu1 %v2898_v32  ;;  %v2914_v63 = vpack.c.bf16 %v289_v62, %v288_v61  ;;  %v460_v1 = vld [vmem:[%s4491_s6 + $0x10] sm:$0xff]  ;;  %v461_v4 = vld [vmem:[%s4491_s6 + $0x18] sm:$0xff]  ;;  %v462_v5 = vld [vmem:[%s4491_s6 + $0x20] sm:$0xff] }
  0x48   :  { %476 = vperm.xlu0 %3053, %v458_v0   ;;  %486 = vperm.xlu1 %3054, %v460_v1   ;;  %v463_v6 = vld [vmem:[%s4491_s6 + $0x28] sm:$0xff]  ;;  %v464_v7 = vld [vmem:[%s4491_s6 + $0x30] sm:$0xff]  ;;  %v465_v8 = vld [vmem:[%s4491_s6 + $0x38] sm:$0xff] }
  0x49   :  { %v466_v9 = vld [vmem:[%s4491_s6 + $0x40] sm:$0xff]  ;;  %v467_v10 = vld [vmem:[%s4491_s6 + $0x48] sm:$0xff]  ;;  %v468_v11 = vld [vmem:[%s4491_s6 + $0x50] sm:$0xff] }
  0x4a   :  { %2873 = vmatpush3.bf16.msra.mxu0 %v2870_v21  ;;  %2901 = vmatpush3.bf16.msra.mxu1 %v2898_v32  ;;  %v469_v12 = vld [vmem:[%s4491_s6 + $0x58] sm:$0xff]  ;;  %v470_v13 = vld [vmem:[%s4491_s6 + $0x60] sm:$0xff]  ;;  %v471_v14 = vld [vmem:[%s4491_s6 + $0x68] sm:$0xff] }
  0x4b   :  { %2875 = vmatprep.subr.bf16.mxu0 %v2874_v27  ;;  %2903 = vmatprep.subr.bf16.mxu1 %v2902_v38  ;;  %v472_v15 = vld [vmem:[%s4491_s6 + $0x70] sm:$0xff]  ;;  %v473_v16 = vld [vmem:[%s4491_s6 + $0x78] sm:$0xff]  ;;  %v2242_v17 = vld [vmem:[%s4487_s2] ss:$0 sm:$0xff] }
  0x4c   :  { %481 = vperm.xlu0 %3053, %v459_v3   ;;  %491 = vperm.xlu1 %3054, %v461_v4   ;;  %v3682_v2 = vld [vmem:[%s4492_s7] ss:$0 sm:$0xff] }
  0x4d   :  { %v442_v4 = vld [vmem:[#allocation8] sm:$0xff] }
  0x4e   :  { %2877 = vmatpush3.bf16.msra.mxu0 %v2874_v27  ;;  %2905 = vmatpush3.bf16.msra.mxu1 %v2902_v38 }
  0x4f   :  { %2879 = vmatprep.subr.bf16.mxu0 %v2878_v33  ;;  %2907 = vmatprep.subr.bf16.mxu1 %v2906_v42 }
  0x50   :  { %496 = vperm.xlu0 %3053, %v462_v5   ;;  %501 = vperm.xlu1 %3054, %v463_v6  }
  0x52   :  { %2881 = vmatpush3.bf16.msra.mxu0 %v2878_v33  ;;  %2909 = vmatpush3.bf16.msra.mxu1 %v2906_v42 }
  0x53   :  { %2883 = vmatprep.subr.bf16.mxu0 %v2882_v39  ;;  %2911 = vmatprep.subr.bf16.mxu1 %v2910_v46 }
  0x54   :  { %506 = vperm.xlu0 %3053, %v464_v7   ;;  %511 = vperm.xlu1 %3054, %v465_v8   ;;  %v3692_v7 = vld [vmem:[%s4489_s4] ss:$0 sm:$0xff] }
  0x56   :  { %2885 = vmatpush3.bf16.msra.mxu0 %v2882_v39  ;;  %2913 = vmatpush3.bf16.msra.mxu1 %v2910_v46 }
  0x57   :  { %2915 = vmatprep.subr.bf16.mxu1 %v2914_v63 }
  0x58   :  { %516 = vperm.xlu0 %3053, %v466_v9   ;;  %521 = vperm.xlu1 %3054, %v467_v10   ;;  %v3697_v9 = vld [vmem:[%s4493_s8] ss:$0 sm:$0xff] }
  0x59   :  { %2551 = vmatmul.mubr.f32.vlgmr.msra.gmra.mrb[0].mxu0 %v75_v45 }
  0x5a   :  { %2553 = vmatprep.mubr.f32.mxu0 %v76_v47  ;;  %2917 = vmatpush3.bf16.msra.mxu1 %v2914_v63 }
  0x5c   :  { %526 = vperm.xlu0 %3053, %v468_v11   ;;  %531 = vperm.xlu1 %3054, %v469_v12  }
  0x5d   :  { %2554 = vmatmul.mubr.f32.gmra.mrb[2].mxu0 %v77_v48 }
  0x5e   :  { %2556 = vmatprep.mubr.f32.mxu0 %v78_v49 }
  0x60   :  { %536 = vperm.xlu0 %3053, %v470_v13   ;;  %541 = vperm.xlu1 %3054, %v471_v14  }
  0x61   :  { %2557 = vmatmul.mubr.f32.gmra.mrb[4].mxu0 %v79_v50 }
  0x62   :  { %2559 = vmatprep.mubr.f32.mxu0 %v80_v51 }
  0x64   :  { %546 = vperm.xlu0 %3053, %v472_v15   ;;  %551 = vperm.xlu1 %3054, %v473_v16  }
  0x65   :  { %2560 = vmatmul.mubr.f32.gmra.mrb[6].mxu0 %v81_v52 }
  0x66   :  { %2562 = vmatprep.mubr.f32.mxu0 %v82_v53 }
  0x69   :  { %2563 = vmatmul.mubr.f32.gmra.mrb[8].mxu0 %v83_v54 }
  0x6a   :  { %2565 = vmatprep.mubr.f32.mxu0 %v84_v55 }
  0x6d   :  { %2566 = vmatmul.mubr.f32.gmra.mrb[10].mxu0 %v85_v56 }
  0x6e   :  { %2568 = vmatprep.mubr.f32.mxu0 %v86_v57 }
  0x71   :  { %2569 = vmatmul.mubr.f32.gmra.mrb[12].mxu0 %v87_v58 }
  0x72   :  { %2571 = vmatprep.mubr.f32.mxu0 %v88_v59 }
  0x75   :  { %2572 = vmatmul.mubr.f32.gmra.mrb[14].mxu0 %v89_v60 }
  0xc7   :  { %v477_v3 = vpop.permute.xlu0 %476 }
  0xc8   :  { %v554_v5 = vmul.f32 %v477_v3, %v442_v4  ;;  %v443_v3 = vld [vmem:[#allocation8 + $0x8] sm:$0xff] }
  0xca   :  { %v3685_v6 = vmul.f32 %v3682_v2, %v554_v5 }
  0xcc   :  { %2662 = vmatprep.mubr.f32.mxu0 %v3685_v6 }
 0x12c   :  { %v2552_v18 = vpop.f32.mrb[0].mxu0 }
 0x12d   :  { %v185_v19 = vadd.f32 %v2552_v18, %v2242_v17  ;;  %v179_v20 = vpop.f32.mrb[1].mxu0 }
 0x12e   :  { %v180_v21 = vadd.f32 %v2242_v17, %v179_v20 }
 0x12f   :  { %v259_v24 = vmax.f32 %v185_v19, 0.0 }
 0x130   :  { %v2555_v22 = vpop.f32.mrb[2].mxu0  ;;  %v258_v23 = vmax.f32 %v180_v21, 0.0 }
 0x131   :  { %v195_v25 = vadd.f32 %v2555_v22, %v2242_v17  ;;  %v189_v26 = vpop.f32.mrb[3].mxu0 }
 0x132   :  { %v190_v27 = vadd.f32 %v2242_v17, %v189_v26  ;;  %2606 = vmatprep.mubr.f32.mxu1 %v258_v23 }
 0x133   :  { %2607 = vmatmul.mubr.f32.vlgmr.msra.gmra.mrb[0].mxu1 %v259_v24  ;;  %v261_v30 = vmax.f32 %v195_v25, 0.0 }
 0x134   :  { %v260_v28 = vmax.f32 %v190_v27, 0.0  ;;  %v2558_v29 = vpop.f32.mrb[4].mxu0 }
 0x135   :  { %v205_v31 = vadd.f32 %v2558_v29, %v2242_v17  ;;  %v199_v32 = vpop.f32.mrb[5].mxu0 }
 0x136   :  { %v200_v33 = vadd.f32 %v2242_v17, %v199_v32  ;;  %2609 = vmatprep.mubr.f32.mxu1 %v260_v28 }
 0x137   :  { %2610 = vmatmul.mubr.f32.gmra.mrb[2].mxu1 %v261_v30  ;;  %v263_v36 = vmax.f32 %v205_v31, 0.0 }
 0x138   :  { %v262_v34 = vmax.f32 %v200_v33, 0.0  ;;  %v2561_v35 = vpop.f32.mrb[6].mxu0  ;;  %v487_v33 = vpop.permute.xlu1 %486 }
 0x139   :  { %v215_v37 = vadd.f32 %v2561_v35, %v2242_v17  ;;  %v209_v38 = vpop.f32.mrb[7].mxu0 }
 0x13a   :  { %v210_v39 = vadd.f32 %v2242_v17, %v209_v38  ;;  %2612 = vmatprep.mubr.f32.mxu1 %v262_v34 }
 0x13b   :  { %2613 = vmatmul.mubr.f32.gmra.mrb[4].mxu1 %v263_v36  ;;  %v265_v42 = vmax.f32 %v215_v37, 0.0 }
 0x13c   :  { %v264_v40 = vmax.f32 %v210_v39, 0.0  ;;  %v2564_v41 = vpop.f32.mrb[8].mxu0 }
 0x13d   :  { %v225_v43 = vadd.f32 %v2564_v41, %v2242_v17  ;;  %v219_v44 = vpop.f32.mrb[9].mxu0  ;;  %v482_v41 = vpop.permute.xlu0 %481 }
 0x13e   :  { %v220_v45 = vadd.f32 %v2242_v17, %v219_v44  ;;  %2615 = vmatprep.mubr.f32.mxu1 %v264_v40 }
 0x13f   :  { %2616 = vmatmul.mubr.f32.gmra.mrb[6].mxu1 %v265_v42  ;;  %v267_v48 = vmax.f32 %v225_v43, 0.0 }
 0x140   :  { %v266_v46 = vmax.f32 %v220_v45, 0.0  ;;  %v2567_v47 = vpop.f32.mrb[10].mxu0 }
 0x141   :  { %v235_v49 = vadd.f32 %v2567_v47, %v2242_v17  ;;  %v229_v50 = vpop.f32.mrb[11].mxu0 }
 0x142   :  { %v230_v51 = vadd.f32 %v2242_v17, %v229_v50  ;;  %2618 = vmatprep.mubr.f32.mxu1 %v266_v46 }
 0x143   :  { %2619 = vmatmul.mubr.f32.gmra.mrb[8].mxu1 %v267_v48  ;;  %v269_v54 = vmax.f32 %v235_v49, 0.0  ;;  %v492_v48 = vpop.permute.xlu1 %491 }
 0x144   :  { %v268_v52 = vmax.f32 %v230_v51, 0.0  ;;  %v2570_v53 = vpop.f32.mrb[12].mxu0 }
 0x145   :  { %v245_v55 = vadd.f32 %v2570_v53, %v2242_v17  ;;  %v239_v56 = vpop.f32.mrb[13].mxu0 }
 0x146   :  { %v240_v57 = vadd.f32 %v2242_v17, %v239_v56  ;;  %2621 = vmatprep.mubr.f32.mxu1 %v268_v52 }
 0x147   :  { %2622 = vmatmul.mubr.f32.gmra.mrb[10].mxu1 %v269_v54  ;;  %v271_v60 = vmax.f32 %v245_v55, 0.0  ;;  %v497_v54 = vpop.permute.xlu0 %496 }
 0x148   :  { %v270_v58 = vmax.f32 %v240_v57, 0.0  ;;  %v2573_v59 = vpop.f32.mrb[14].mxu0 }
 0x149   :  { %v255_v61 = vadd.f32 %v2573_v59, %v2242_v17  ;;  %v249_v62 = vpop.f32.mrb[15].mxu0 }
 0x14a   :  { %v250_v63 = vadd.f32 %v2242_v17, %v249_v62  ;;  %2624 = vmatprep.mubr.f32.mxu1 %v270_v58  ;;  %v502_v58 = vpop.permute.xlu1 %501 }
 0x14b   :  { %2625 = vmatmul.mubr.f32.gmra.mrb[12].mxu1 %v271_v60  ;;  %v273_v1 = vmax.f32 %v255_v61, 0.0  ;;  %v507_v5 = vpop.permute.xlu0 %506 }
 0x14c   :  { %v272_v0 = vmax.f32 %v250_v63, 0.0  ;;  %v444_v63 = vld [vmem:[#allocation8 + $0x10] sm:$0xff] }
 0x14e   :  { %2627 = vmatprep.mubr.f32.mxu1 %v272_v0 }
 0x14f   :  { %2628 = vmatmul.mubr.f32.gmra.mrb[14].mxu1 %v273_v1 }
 0x150   :  { %2718 = vmatprep.mubr.f32.mxu1 %v3685_v6 }
 0x206   :  { %v2608_v8 = vpop.f32.mrb[0].mxu1 }
 0x207   :  { %v3700_v10 = vadd.f32 %v2608_v8, %v3692_v7  ;;  %v363_v11 = vpop.f32.mrb[1].mxu1  ;;  %v556_v8 = vmul.f32 %v487_v33, %v444_v63 }
 0x208   :  { %v3703_v12 = vadd.f32 %v3692_v7, %v363_v11 }
 0x209   :  { %v1345_v13 = vmul.f32 %v3697_v9, %v3700_v10 }
 0x20a   :  { %v2611_v14 = vpop.f32.mrb[2].mxu1  ;;  %v1344_v15 = vmul.f32 %v3697_v9, %v3703_v12  ;;  %v2918_v16 = vpack.c.bf16 %v3700_v10, %v3703_v12 }
 0x20b   :  { %v3712_v17 = vadd.f32 %v2611_v14, %v3692_v7  ;;  %1426 = vadd.xlane.f32.xlu1 %v1345_v13  ;;  %v373_v18 = vpop.f32.mrb[3].mxu1 }
 0x20c   :  { %v3715_v19 = vadd.f32 %v3692_v7, %v373_v18  ;;  %1424 = vadd.xlane.f32.xlu0 %v1344_v15  ;;  %2919 = vmatprep.subr.bf16.mxu0 %v2918_v16  ;;  %v555_v15 = vmul.f32 %v482_v41, %v443_v3  ;;  %v512_v18 = vpop.permute.xlu1 %511  ;;  %v455_v3 = vld [vmem:[#allocation8 + $0x68] sm:$0xff] }
 0x20d   :  { %2921 = vmatpush3.bf16.msra.mxu0 %v2918_v16  ;;  %v1347_v20 = vmul.f32 %v3697_v9, %v3712_v17  ;;  %v445_v16 = vld [vmem:[#allocation8 + $0x18] sm:$0xff] }
 0x20e   :  { %v2614_v21 = vpop.f32.mrb[4].mxu1  ;;  %v2922_v22 = vpack.c.bf16 %v3712_v17, %v3715_v19  ;;  %v1346_v28 = vmul.f32 %v3697_v9, %v3715_v19 }
 0x20f   :  { %v3722_v23 = vadd.f32 %v2614_v21, %v3692_v7  ;;  %v383_v24 = vpop.f32.mrb[5].mxu1 }
 0x210   :  { %v3725_v25 = vadd.f32 %v3692_v7, %v383_v24  ;;  %1430 = vadd.xlane.f32.xlu0 %v1347_v20  ;;  %2923 = vmatprep.subr.bf16.mxu0 %v2922_v22  ;;  %v3794_v20 = vmul.f32 %v3682_v2, %v556_v8  ;;  %v557_v24 = vmul.f32 %v492_v48, %v445_v16  ;;  %v456_v8 = vld [vmem:[#allocation8 + $0x70] sm:$0xff] }
 0x211   :  { %2925 = vmatpush3.bf16.msra.mxu0 %v2922_v22  ;;  %v1349_v36 = vmul.f32 %v3697_v9, %v3722_v23  ;;  %v3799_v22 = vmul.f32 %v3682_v2, %v555_v15 }
 0x212   :  { %v2617_v26 = vpop.f32.mrb[6].mxu1  ;;  %v1348_v27 = vmul.f32 %v3697_v9, %v3725_v25  ;;  %v2926_v29 = vpack.c.bf16 %v3722_v23, %v3725_v25  ;;  %v3804_v33 = vmul.f32 %v3682_v2, %v557_v24 }
 0x213   :  { %v3734_v30 = vadd.f32 %v2617_v26, %v3692_v7  ;;  %v393_v31 = vpop.f32.mrb[7].mxu1  ;;  %v517_v26 = vpop.permute.xlu0 %516 }
 0x214   :  { %v3737_v32 = vadd.f32 %v3692_v7, %v393_v31  ;;  %1432 = vadd.xlane.f32.xlu1 %v1348_v27  ;;  %1428 = vadd.xlane.f32.xlu0 %v1346_v28  ;;  %v447_v28 = vld [vmem:[#allocation8 + $0x28] sm:$0xff]  ;;  %v522_v31 = vpop.permute.xlu1 %521 }
 0x215   :  { %2927 = vmatprep.subr.bf16.mxu0 %v2926_v29  ;;  %v1351_v44 = vmul.f32 %v3697_v9, %v3734_v30 }
 0x216   :  { %2929 = vmatpush3.bf16.msra.mxu0 %v2926_v29  ;;  %v2620_v34 = vpop.f32.mrb[8].mxu1  ;;  %v1350_v35 = vmul.f32 %v3697_v9, %v3737_v32  ;;  %v2930_v37 = vpack.c.bf16 %v3734_v30, %v3737_v32  ;;  %v448_v29 = vld [vmem:[#allocation8 + $0x30] sm:$0xff] }
 0x217   :  { %v3746_v38 = vadd.f32 %v2620_v34, %v3692_v7  ;;  %v403_v39 = vpop.f32.mrb[9].mxu1  ;;  %v559_v34 = vmul.f32 %v502_v58, %v447_v28  ;;  %v527_v41 = vpop.permute.xlu0 %526  ;;  %v453_v58 = vld [vmem:[#allocation8 + $0x58] sm:$0xff] }
 0x218   :  { %v3749_v40 = vadd.f32 %v3692_v7, %v403_v39  ;;  %1436 = vadd.xlane.f32.xlu1 %v1350_v35  ;;  %1434 = vadd.xlane.f32.xlu0 %v1349_v36  ;;  %v560_v36 = vmul.f32 %v507_v5, %v448_v29  ;;  %v450_v39 = vld [vmem:[#allocation8 + $0x40] sm:$0xff]  ;;  %v532_v48 = vpop.permute.xlu1 %531 }
 0x219   :  { %2931 = vmatprep.subr.bf16.mxu0 %v2930_v37  ;;  %v1353_v52 = vmul.f32 %v3697_v9, %v3746_v38 }
 0x21a   :  { %2933 = vmatpush3.bf16.msra.mxu0 %v2930_v37  ;;  %v2623_v42 = vpop.f32.mrb[10].mxu1  ;;  %v1352_v43 = vmul.f32 %v3697_v9, %v3749_v40  ;;  %v2934_v45 = vpack.c.bf16 %v3746_v38, %v3749_v40  ;;  %v449_v37 = vld [vmem:[#allocation8 + $0x38] sm:$0xff] }
 0x21b   :  { %v3758_v46 = vadd.f32 %v2623_v42, %v3692_v7  ;;  %v413_v47 = vpop.f32.mrb[11].mxu1  ;;  %v3812_v42 = vmul.f32 %v3682_v2, %v559_v34 }
 0x21c   :  { %v3761_v49 = vadd.f32 %v3692_v7, %v413_v47  ;;  %1440 = vadd.xlane.f32.xlu1 %v1352_v43  ;;  %1438 = vadd.xlane.f32.xlu0 %v1351_v44  ;;  %v561_v43 = vmul.f32 %v512_v18, %v449_v37  ;;  %v3815_v44 = vmul.f32 %v3682_v2, %v560_v36  ;;  %v451_v47 = vld [vmem:[#allocation8 + $0x48] sm:$0xff]  ;;  %v457_v18 = vld [vmem:[#allocation8 + $0x78] sm:$0xff] }
 0x21d   :  { %2935 = vmatprep.subr.bf16.mxu0 %v2934_v45  ;;  %v1355_v61 = vmul.f32 %v3697_v9, %v3758_v46  ;;  %4523 = vst [vmem:[#allocation15_spill] sm:$0xff] %v3812_v42 }
 0x21e   :  { %2937 = vmatpush3.bf16.msra.mxu0 %v2934_v45  ;;  %v2626_v50 = vpop.f32.mrb[12].mxu1  ;;  %v1354_v51 = vmul.f32 %v3697_v9, %v3761_v49  ;;  %v2938_v53 = vpack.c.bf16 %v3758_v46, %v3761_v49  ;;  %4524 = vst [vmem:[#allocation16_spill] sm:$0xff] %v3815_v44  ;;  %v562_v45 = vmul.f32 %v517_v26, %v450_v39 }
 0x21f   :  { %v3770_v55 = vadd.f32 %v2626_v50, %v3692_v7  ;;  %v423_v56 = vpop.f32.mrb[13].mxu1  ;;  %v452_v50 = vld [vmem:[#allocation8 + $0x50] sm:$0xff] }
 0x220   :  { %v3773_v57 = vadd.f32 %v3692_v7, %v423_v56  ;;  %1444 = vadd.xlane.f32.xlu1 %v1354_v51  ;;  %1442 = vadd.xlane.f32.xlu0 %v1353_v52  ;;  %v3820_v51 = vmul.f32 %v3682_v2, %v561_v43  ;;  %v563_v52 = vmul.f32 %v522_v31, %v451_v47 }
 0x221   :  { %2939 = vmatprep.subr.bf16.mxu0 %v2938_v53  ;;  %v1357_v13 = vmul.f32 %v3697_v9, %v3770_v55  ;;  %v564_v56 = vmul.f32 %v527_v41, %v452_v50 }
 0x222   :  { %2941 = vmatpush3.bf16.msra.mxu0 %v2938_v53  ;;  %v2629_v59 = vpop.f32.mrb[14].mxu1  ;;  %v1356_v60 = vmul.f32 %v3697_v9, %v3773_v57  ;;  %v2942_v62 = vpack.c.bf16 %v3770_v55, %v3773_v57  ;;  %4525 = vst [vmem:[#allocation17_spill] sm:$0xff] %v3820_v51  ;;  %v537_v53 = vpop.permute.xlu0 %536 }
 0x223   :  { %v3782_v0 = vadd.f32 %v2629_v59, %v3692_v7  ;;  %v433_v1 = vpop.f32.mrb[15].mxu1  ;;  %v454_v59 = vld [vmem:[#allocation8 + $0x60] sm:$0xff]  ;;  %v3831_v63 = vmul.f32 %v3682_v2, %v564_v56 }
 0x224   :  { %v3785_v4 = vadd.f32 %v3692_v7, %v433_v1  ;;  %1448 = vadd.xlane.f32.xlu1 %v1356_v60  ;;  %1446 = vadd.xlane.f32.xlu0 %v1355_v61  ;;  %v446_v7 = vld [vmem:[#allocation8 + $0x20] sm:$0xff]  ;;  %v542_v60 = vpop.permute.xlu1 %541  ;;  %v3828_v61 = vmul.f32 %v3682_v2, %v563_v52  ;;  %v566_v1 = vmul.f32 %v537_v53, %v454_v59 }
 0x225   :  { %4521 = vst [vmem:[#allocation13_spill] sm:$0xff] %v3782_v0  ;;  %2943 = vmatprep.subr.bf16.mxu0 %v2942_v62  ;;  %v1359_v21 = vmul.f32 %v3697_v9, %v3782_v0  ;;  %v558_v27 = vmul.f32 %v497_v54, %v446_v7  ;;  %v3823_v54 = vmul.f32 %v3682_v2, %v562_v45  ;;  %4528 = vst [vmem:[#allocation20_spill] sm:$0xff] %v3831_v63 }
 0x226   :  { %4522 = vst [vmem:[#allocation14_spill] sm:$0xff] %v3785_v4  ;;  %2945 = vmatpush3.bf16.msra.mxu0 %v2942_v62  ;;  %v1358_v11 = vmul.f32 %v3697_v9, %v3785_v4  ;;  %v2946_v14 = vpack.c.bf16 %v3782_v0, %v3785_v4  ;;  %4527 = vst [vmem:[#allocation19_spill] sm:$0xff] %v3828_v61  ;;  %v565_v62 = vmul.f32 %v532_v48, %v453_v58  ;;  %v547_v5 = vpop.permute.xlu0 %546 }
 0x227   :  { %v3807_v35 = vmul.f32 %v3682_v2, %v558_v27  ;;  %4526 = vst [vmem:[#allocation18_spill] sm:$0xff] %v3823_v54  ;;  %v568_v15 = vmul.f32 %v547_v5, %v456_v8 }
 0x228   :  { %1452 = vadd.xlane.f32.xlu1 %v1358_v11  ;;  %1450 = vadd.xlane.f32.xlu0 %v1357_v13  ;;  %v3836_v11 = vmul.f32 %v3682_v2, %v565_v62  ;;  %v567_v13 = vmul.f32 %v542_v60, %v455_v3  ;;  %v552_v16 = vpop.permute.xlu1 %551 }
 0x229   :  { %2947 = vmatprep.subr.bf16.mxu0 %v2946_v14  ;;  %v3847_v24 = vmul.f32 %v3682_v2, %v568_v15 }
 0x22a   :  { %2949 = vmatpush3.bf16.msra.mxu0 %v2946_v14  ;;  %4529 = vst [vmem:[#allocation21_spill] sm:$0xff] %v3836_v11  ;;  %v3839_v14 = vmul.f32 %v3682_v2, %v566_v1  ;;  %v3844_v7 = vmul.f32 %v3682_v2, %v567_v13 }
 0x22b   :  { %4532 = vst [vmem:[#allocation24_spill] sm:$0xff] %v3847_v24 }
 0x22c   :  { %1454 = vadd.xlane.f32.xlu0 %v1359_v21  ;;  %4530 = vst [vmem:[#allocation22_spill] sm:$0xff] %v3839_v14  ;;  %4531 = vst [vmem:[#allocation23_spill] sm:$0xff] %v3844_v7  ;;  %v569_v21 = vmul.f32 %v552_v16, %v457_v18 }
 0x22d   :  { %2663 = vmatmul.mubr.f32.vlgmr.msra.gmra.mrb[16].mxu0 %v3799_v22 }
 0x22e   :  { %2665 = vmatprep.mubr.f32.mxu0 %v3794_v20  ;;  %v3852_v26 = vmul.f32 %v3682_v2, %v569_v21 }
 0x230   :  { %4533 = vst [vmem:[#allocation25_spill] sm:$0xff] %v3852_v26 }
 0x231   :  { %2666 = vmatmul.mubr.f32.gmra.mrb[18].mxu0 %v3804_v33 }
 0x232   :  { %2668 = vmatprep.mubr.f32.mxu0 %v3807_v35 }
 0x235   :  { %2669 = vmatmul.mubr.f32.gmra.mrb[20].mxu0 %v3812_v42 }
 0x236   :  { %2671 = vmatprep.mubr.f32.mxu0 %v3815_v44 }
 0x239   :  { %2672 = vmatmul.mubr.f32.gmra.mrb[22].mxu0 %v3820_v51 }
 0x23a   :  { %2674 = vmatprep.mubr.f32.mxu0 %v3823_v54 }
 0x23d   :  { %2675 = vmatmul.mubr.f32.gmra.mrb[24].mxu0 %v3828_v61 }
 0x23e   :  { %2677 = vmatprep.mubr.f32.mxu0 %v3831_v63 }
 0x241   :  { %2678 = vmatmul.mubr.f32.gmra.mrb[26].mxu0 %v3836_v11 }
 0x242   :  { %2680 = vmatprep.mubr.f32.mxu0 %v3839_v14 }
 0x245   :  { %2681 = vmatmul.mubr.f32.gmra.mrb[28].mxu0 %v3844_v7 }
 0x246   :  { %2683 = vmatprep.mubr.f32.mxu0 %v3847_v24 }
 0x249   :  { %2684 = vmatmul.mubr.f32.gmra.mrb[30].mxu0 %v3852_v26 }
 0x24a   :  { %2774 = vmatprep.mubr.f32.mxu0 %v3685_v6 }
 0x300   :  { %v3856_v27 = vpop.f32.mrb[16].mxu0 }
 0x301   :  { %v3858_v28 = vpop.f32.mrb[17].mxu0  ;;  %v1361_v29 = vmul.f32 %v3856_v27, %v3697_v9 }
 0x302   :  { %v2950_v31 = vpack.c.bf16 %v3856_v27, %v3858_v28  ;;  %v1360_v34 = vmul.f32 %v3697_v9, %v3858_v28 }
 0x303   :  { %1458 = vadd.xlane.f32.xlu0 %v1361_v29 }
 0x304   :  { %1456 = vadd.xlane.f32.xlu1 %v1360_v34  ;;  %v3866_v2 = vpop.f32.mrb[18].mxu0  ;;  %2951 = vmatprep.subr.bf16.mxu1 %v2950_v31 }
 0x305   :  { %v3868_v36 = vpop.f32.mrb[19].mxu0  ;;  %2953 = vmatpush3.bf16.msra.mxu1 %v2950_v31  ;;  %v1363_v37 = vmul.f32 %v3866_v2, %v3697_v9 }
 0x306   :  { %v2954_v39 = vpack.c.bf16 %v3866_v2, %v3868_v36  ;;  %v1362_v41 = vmul.f32 %v3697_v9, %v3868_v36 }
 0x307   :  { %1462 = vadd.xlane.f32.xlu0 %v1363_v37 }
 0x308   :  { %1460 = vadd.xlane.f32.xlu1 %v1362_v41  ;;  %v3876_v43 = vpop.f32.mrb[20].mxu0  ;;  %2955 = vmatprep.subr.bf16.mxu1 %v2954_v39 }
 0x309   :  { %v3878_v45 = vpop.f32.mrb[21].mxu0  ;;  %2957 = vmatpush3.bf16.msra.mxu1 %v2954_v39  ;;  %v1365_v47 = vmul.f32 %v3876_v43, %v3697_v9 }
 0x30a   :  { %v2958_v48 = vpack.c.bf16 %v3876_v43, %v3878_v45  ;;  %v1364_v50 = vmul.f32 %v3697_v9, %v3878_v45 }
 0x30b   :  { %1466 = vadd.xlane.f32.xlu0 %v1365_v47 }
 0x30c   :  { %1464 = vadd.xlane.f32.xlu1 %v1364_v50  ;;  %v3886_v52 = vpop.f32.mrb[22].mxu0  ;;  %2959 = vmatprep.subr.bf16.mxu1 %v2958_v48 }
 0x30d   :  { %v3888_v53 = vpop.f32.mrb[23].mxu0  ;;  %2961 = vmatpush3.bf16.msra.mxu1 %v2958_v48  ;;  %v1367_v56 = vmul.f32 %v3886_v52, %v3697_v9 }
 0x30e   :  { %v2962_v58 = vpack.c.bf16 %v3886_v52, %v3888_v53  ;;  %v1366_v59 = vmul.f32 %v3697_v9, %v3888_v53 }
 0x30f   :  { %1470 = vadd.xlane.f32.xlu0 %v1367_v56  ;;  %v1425_v56 = vpop.xlane.xlu0 %1424 }
 0x310   :  { %1468 = vadd.xlane.f32.xlu1 %v1366_v59  ;;  %v3896_v60 = vpop.f32.mrb[24].mxu0  ;;  %2963 = vmatprep.subr.bf16.mxu1 %v2962_v58 }
 0x311   :  { %v3898_v62 = vpop.f32.mrb[25].mxu0  ;;  %2965 = vmatpush3.bf16.msra.mxu1 %v2962_v58  ;;  %v1369_v1 = vmul.f32 %v3896_v60, %v3697_v9 }
 0x312   :  { %v2966_v3 = vpack.c.bf16 %v3896_v60, %v3898_v62  ;;  %v1368_v5 = vmul.f32 %v3697_v9, %v3898_v62 }
 0x313   :  { %1474 = vadd.xlane.f32.xlu0 %v1369_v1  ;;  %v1431_v58 = vpop.xlane.xlu0 %1430  ;;  %v1427_v1 = vpop.xlane.xlu1 %1426 }
 0x314   :  { %1472 = vadd.xlane.f32.xlu1 %v1368_v5  ;;  %v3906_v8 = vpop.f32.mrb[26].mxu0  ;;  %2967 = vmatprep.subr.bf16.mxu1 %v2966_v3 }
 0x315   :  { %v3908_v13 = vpop.f32.mrb[27].mxu0  ;;  %2969 = vmatpush3.bf16.msra.mxu1 %v2966_v3  ;;  %v1371_v15 = vmul.f32 %v3906_v8, %v3697_v9 }
 0x316   :  { %v2970_v16 = vpack.c.bf16 %v3906_v8, %v3908_v13  ;;  %v1370_v18 = vmul.f32 %v3697_v9, %v3908_v13 }
 0x317   :  { %1478 = vadd.xlane.f32.xlu0 %v1371_v15  ;;  %v1429_v59 = vpop.xlane.xlu0 %1428  ;;  %v1433_v5 = vpop.xlane.xlu1 %1432 }
 0x318   :  { %1476 = vadd.xlane.f32.xlu1 %v1370_v18  ;;  %v3916_v21 = vpop.f32.mrb[28].mxu0  ;;  %2971 = vmatprep.subr.bf16.mxu1 %v2970_v16 }
 0x319   :  { %v3918_v29 = vpop.f32.mrb[29].mxu0  ;;  %2973 = vmatpush3.bf16.msra.mxu1 %v2970_v16  ;;  %v1373_v31 = vmul.f32 %v3916_v21, %v3697_v9  ;;  %v2247_v16 = vmul.f32 -1.442695, %v1427_v1 }
 0x31a   :  { %v2974_v34 = vpack.c.bf16 %v3916_v21, %v3918_v29  ;;  %v1372_v37 = vmul.f32 %v3697_v9, %v3918_v29 }
 0x31b   :  { %1482 = vadd.xlane.f32.xlu0 %v1373_v31  ;;  %v1435_v3 = vpop.xlane.xlu0 %1434  ;;  %v1437_v18 = vpop.xlane.xlu1 %1436  ;;  %v2246_v31 = vmul.f32 -1.442695, %v1425_v56  ;;  %3055 = vpow2.f32 %v2247_v16 }
 0x31c   :  { %1480 = vadd.xlane.f32.xlu1 %v1372_v37  ;;  %v3926_v39 = vpop.f32.mrb[30].mxu0  ;;  %2975 = vmatprep.subr.bf16.mxu1 %v2974_v34  ;;  %v2250_v37 = vmul.f32 -1.442695, %v1433_v5  ;;  %v2252_v4 = vmul.f32 -1.442695, %v1437_v18 }
 0x31d   :  { %4534 = vst [vmem:[#allocation26_spill] sm:$0xff] %v3926_v39  ;;  %v3928_v41 = vpop.f32.mrb[31].mxu0  ;;  %2977 = vmatpush3.bf16.msra.mxu1 %v2974_v34  ;;  %v1375_v47 = vmul.f32 %v3926_v39, %v3697_v9  ;;  %v2249_v34 = vmul.f32 -1.442695, %v1431_v58  ;;  %3057 = vpow2.f32 %v2246_v31 }
 0x31e   :  { %4535 = vst [vmem:[#allocation27_spill] sm:$0xff] %v3928_v41  ;;  %v2978_v48 = vpack.c.bf16 %v3926_v39, %v3928_v41  ;;  %v1374_v50 = vmul.f32 %v3697_v9, %v3928_v41 }
 0x31f   :  { %1486 = vadd.xlane.f32.xlu0 %v1375_v47  ;;  %v1439_v15 = vpop.xlane.xlu0 %1438  ;;  %3059 = vpow2.f32 %v2249_v34 }
 0x320   :  { %1484 = vadd.xlane.f32.xlu1 %v1374_v50  ;;  %2979 = vmatprep.subr.bf16.mxu1 %v2978_v48  ;;  %v1441_v50 = vpop.xlane.xlu1 %1440  ;;  %3061 = vpow2.f32 %v2250_v37 }
 0x321   :  { %2981 = vmatpush3.bf16.msra.mxu1 %v2978_v48  ;;  %v2248_v48 = vmul.f32 -1.442695, %v1429_v59  ;;  %v2254_v1 = vmul.f32 -1.442695, %v1441_v50  ;;  %v2253_v59 = vmul.f32 -1.442695, %v1439_v15 }
 0x323   :  { %v1443_v47 = vpop.xlane.xlu0 %1442  ;;  %3063 = vpow2.f32 %v2248_v48 }
 0x324   :  { %2719 = vmatmul.mubr.f32.vlgmr.msra.gmra.mrb[16].mxu1 %v3799_v22  ;;  %v1445_v0 = vpop.xlane.xlu1 %1444  ;;  %3065 = vpow2.f32 %v2252_v4  ;;  %v2255_v4 = vmul.f32 -1.442695, %v1443_v47 }
 0x325   :  { %2721 = vmatprep.mubr.f32.mxu1 %v3794_v20  ;;  %v3056_v41 = vpop.eup %3055  ;;  %v2256_v37 = vmul.f32 -1.442695, %v1445_v0 }
 0x326   :  { %v1825_v56 = vadd.f32 1.0, %v3056_v41 }
 0x327   :  { %v3058_v39 = vpop.eup %3057 }
 0x328   :  { %2722 = vmatmul.mubr.f32.gmra.mrb[18].mxu1 %v3804_v33  ;;  %v1824_v16 = vadd.f32 1.0, %v3058_v39  ;;  %v1449_v31 = vpop.xlane.xlu1 %1448 }
 0x329   :  { %2724 = vmatprep.mubr.f32.mxu1 %v3807_v35  ;;  %v2258_v39 = vmul.f32 -1.442695, %v1449_v31 }
 0x32c   :  { %2725 = vmatmul.mubr.f32.gmra.mrb[20].mxu1 %v3812_v42  ;;  %v3954_v41 = vpop.xlane.xlu1 %1452 }
 0x32d   :  { %2727 = vmatprep.mubr.f32.mxu1 %v3815_v44  ;;  %4537 = vst [vmem:[#allocation29_spill] sm:$0xff] %v3954_v41 }
 0x330   :  { %2728 = vmatmul.mubr.f32.gmra.mrb[22].mxu1 %v3820_v51 }
 0x331   :  { %2730 = vmatprep.mubr.f32.mxu1 %v3823_v54 }
 0x334   :  { %2731 = vmatmul.mubr.f32.gmra.mrb[24].mxu1 %v3828_v61 }
 0x335   :  { %2733 = vmatprep.mubr.f32.mxu1 %v3831_v63 }
 0x338   :  { %2734 = vmatmul.mubr.f32.gmra.mrb[26].mxu1 %v3836_v11 }
 0x339   :  { %2736 = vmatprep.mubr.f32.mxu1 %v3839_v14 }
 0x33c   :  { %2737 = vmatmul.mubr.f32.gmra.mrb[28].mxu1 %v3844_v7 }
 0x33d   :  { %2739 = vmatprep.mubr.f32.mxu1 %v3847_v24  ;;  %v3060_v24 = vpop.eup %3059 }
 0x33e   :  { %v3062_v5 = vpop.eup %3061  ;;  %v1827_v34 = vadd.f32 1.0, %v3060_v24 }
 0x33f   :  { %v3064_v7 = vpop.eup %3063  ;;  %v1828_v18 = vadd.f32 1.0, %v3062_v5 }
 0x340   :  { %2740 = vmatmul.mubr.f32.gmra.mrb[30].mxu1 %v3852_v26  ;;  %v2251_v26 = vmul.f32 -1.442695, %v1435_v3  ;;  %v1826_v48 = vadd.f32 1.0, %v3064_v7  ;;  %v3066_v50 = vpop.eup %3065 }
 0x341   :  { %2830 = vmatprep.mubr.f32.mxu1 %v3685_v6  ;;  %v1447_v6 = vpop.xlane.xlu0 %1446 }
 0x342   :  { %3067 = vpow2.f32 %v2251_v26  ;;  %v2257_v24 = vmul.f32 -1.442695, %v1447_v6 }
 0x343   :  { %3069 = vpow2.f32 %v2254_v1 }
 0x344   :  { %3071 = vrcp.f32 %v1825_v56  ;;  %v1830_v56 = vadd.f32 1.0, %v3066_v50 }
 0x345   :  { %v1451_v58 = vpop.xlane.xlu0 %1450  ;;  %3073 = vrcp.f32 %v1824_v16 }
 0x346   :  { %3075 = vpow2.f32 %v2253_v59 }
 0x347   :  { %3077 = vrcp.f32 %v1827_v34 }
 0x348   :  { %3079 = vpow2.f32 %v2256_v37 }
 0x349   :  { %v3952_v3 = vpop.xlane.xlu0 %1454  ;;  %3081 = vrcp.f32 %v1828_v18 }
 0x34a   :  { %4536 = vst [vmem:[#allocation28_spill] sm:$0xff] %v3952_v3  ;;  %3083 = vrcp.f32 %v1826_v48 }
 0x34b   :  { %3085 = vpow2.f32 %v2255_v4 }
 0x34c   :  { %v3068_v1 = vpop.eup %3067  ;;  %3087 = vpow2.f32 %v2258_v39 }
 0x34d   :  { %v3070_v16 = vpop.eup %3069  ;;  %v1829_v31 = vadd.f32 1.0, %v3068_v1 }
 0x34e   :  { %v3956_v5 = vpop.eup %3071  ;;  %v1832_v6 = vadd.f32 1.0, %v3070_v16 }
 0x34f   :  { %v3958_v59 = vpop.eup %3073 }
 0x350   :  { %v3076_v18 = vpop.eup %3075 }
 0x351   :  { %v3960_v4 = vpop.eup %3077 }
 0x352   :  { %v3962_v39 = vpop.eup %3079 }
 0x390   :  { %v1459_v26 = vpop.xlane.xlu0 %1458 }
 0x391   :  { %v2263_v15 = vmul.f32 -1.442695, %v1459_v26  ;;  %v1457_v0 = vpop.xlane.xlu1 %1456  ;;  %v3964_v26 = vpop.eup %3081 }
 0x392   :  { %v2262_v7 = vmul.f32 -1.442695, %v1457_v0 }
 0x393   :  { %3089 = vpow2.f32 %v2263_v15  ;;  %v1831_v15 = vadd.f32 1.0, %v3076_v18 }
 0x394   :  { %3091 = vpow2.f32 %v2262_v7  ;;  %v1463_v47 = vpop.xlane.xlu0 %1462  ;;  %v2259_v7 = vmul.f32 -1.442695, %v1451_v58 }
 0x395   :  { %3093 = vpow2.f32 %v2257_v24  ;;  %v2265_v34 = vmul.f32 -1.442695, %v1463_v47  ;;  %v1461_v37 = vpop.xlane.xlu1 %1460  ;;  %v3966_v24 = vpop.eup %3083 }
 0x396   :  { %3095 = vrcp.f32 %v1830_v56  ;;  %v2264_v48 = vmul.f32 -1.442695, %v1461_v37  ;;  %v3086_v16 = vpop.eup %3085 }
 0x397   :  { %3097 = vpow2.f32 %v2265_v34  ;;  %v3968_v47 = vpop.eup %3087  ;;  %v1833_v44 = vadd.f32 1.0, %v3086_v16  ;;  %v1834_v16 = vadd.f32 1.0, %v3962_v39 }
 0x398   :  { %3099 = vpow2.f32 %v2264_v48  ;;  %v1467_v50 = vpop.xlane.xlu0 %1466 }
 0x399   :  { %3101 = vrcp.f32 %v1829_v31  ;;  %v2267_v0 = vmul.f32 -1.442695, %v1467_v50  ;;  %v1465_v1 = vpop.xlane.xlu1 %1464 }
 0x39a   :  { %3103 = vrcp.f32 %v1832_v6  ;;  %v2266_v56 = vmul.f32 -1.442695, %v1465_v1 }
 0x39b   :  { %3105 = vpow2.f32 %v2267_v0 }
 0x39c   :  { %3107 = vpow2.f32 %v2266_v56  ;;  %v1471_v34 = vpop.xlane.xlu0 %1470 }
 0x39d   :  { %v3090_v37 = vpop.eup %3089  ;;  %3109 = vrcp.f32 %v1831_v15  ;;  %v2269_v48 = vmul.f32 -1.442695, %v1471_v34  ;;  %v1469_v3 = vpop.xlane.xlu1 %1468 }
 0x39e   :  { %v3092_v41 = vpop.eup %3091  ;;  %3111 = vpow2.f32 %v2259_v7  ;;  %v1841_v31 = vadd.f32 1.0, %v3090_v37  ;;  %v2268_v18 = vmul.f32 -1.442695, %v1469_v3 }
 0x39f   :  { %v3094_v50 = vpop.eup %3093  ;;  %v1840_v14 = vadd.f32 1.0, %v3092_v41  ;;  %3113 = vpow2.f32 %v2269_v48 }
 0x3a0   :  { %v3970_v6 = vpop.eup %3095  ;;  %3115 = vrcp.f32 %v1841_v31  ;;  %v1475_v58 = vpop.xlane.xlu0 %1474 }
 0x3a1   :  { %v3098_v0 = vpop.eup %3097  ;;  %3117 = vrcp.f32 %v1840_v14  ;;  %v2271_v1 = vmul.f32 -1.442695, %v1475_v58  ;;  %v1473_v56 = vpop.xlane.xlu1 %1472 }
 0x3a2   :  { %v3100_v11 = vpop.eup %3099  ;;  %v1843_v63 = vadd.f32 1.0, %v3098_v0  ;;  %3119 = vpow2.f32 %v2268_v18  ;;  %v2270_v15 = vmul.f32 -1.442695, %v1473_v56 }
 0x3a3   :  { %v3972_v34 = vpop.eup %3101  ;;  %v1842_v7 = vadd.f32 1.0, %v3100_v11  ;;  %3121 = vpow2.f32 %v2271_v1 }
 0x3a4   :  { %v3974_v3 = vpop.eup %3103  ;;  %3123 = vrcp.f32 %v1843_v63  ;;  %v1479_v41 = vpop.xlane.xlu0 %1478 }
 0x3a5   :  { %v3106_v37 = vpop.eup %3105  ;;  %3125 = vrcp.f32 %v1842_v7  ;;  %v2273_v48 = vmul.f32 -1.442695, %v1479_v41  ;;  %v1477_v31 = vpop.xlane.xlu1 %1476 }
 0x3a6   :  { %v3108_v61 = vpop.eup %3107  ;;  %v1845_v14 = vadd.f32 1.0, %v3106_v37  ;;  %3127 = vpow2.f32 %v2270_v15  ;;  %v2272_v58 = vmul.f32 -1.442695, %v1477_v31  ;;  %v2065_v15 = vmul.f32 %v3956_v5, %v3700_v10 }
 0x3a7   :  { %v3976_v54 = vpop.eup %3109  ;;  %v1844_v18 = vadd.f32 1.0, %v3108_v61  ;;  %3129 = vpow2.f32 %v2273_v48  ;;  %v2064_v48 = vmul.f32 %v3958_v59, %v3703_v12  ;;  %v1835_v10 = vadd.f32 1.0, %v3094_v50 }
 0x3a8   :  { %v3112_v0 = vpop.eup %3111  ;;  %3131 = vrcp.f32 %v1845_v14  ;;  %v1483_v11 = vpop.xlane.xlu0 %1482  ;;  %v2067_v12 = vmul.f32 %v3960_v4, %v3712_v17  ;;  %v2066_v59 = vmul.f32 %v3966_v24, %v3715_v19  ;;  %v2069_v19 = vmul.f32 %v3972_v34, %v3722_v23 }
 0x3a9   :  { %v3114_v1 = vpop.eup %3113  ;;  %3133 = vrcp.f32 %v1844_v18  ;;  %v2275_v56 = vmul.f32 -1.442695, %v1483_v11  ;;  %v1481_v63 = vpop.xlane.xlu1 %1480  ;;  %v1837_v17 = vadd.f32 1.0, %v3112_v0 }
 0x3aa   :  { %v3116_v51 = vpop.eup %3115  ;;  %v1847_v7 = vadd.f32 1.0, %v3114_v1  ;;  %3135 = vpow2.f32 %v2272_v58  ;;  %v2274_v41 = vmul.f32 -1.442695, %v1481_v63 }
 0x3ab   :  { %v3118_v42 = vpop.eup %3117  ;;  %v2081_v37 = vmul.f32 %v3116_v51, %v3856_v27  ;;  %3137 = vpow2.f32 %v2275_v56 }
 0x3ac   :  { %v3120_v61 = vpop.eup %3119  ;;  %v2080_v31 = vmul.f32 %v3118_v42, %v3858_v28  ;;  %3139 = vrcp.f32 %v1847_v7 }
 0x3ad   :  { %v3122_v14 = vpop.eup %3121  ;;  %v3985_v18 = vadd.f32 %v2081_v37, %v2065_v15  ;;  %v1846_v58 = vadd.f32 1.0, %v3120_v61  ;;  %3141 = vpow2.f32 %v2274_v41 }
 0x3ae   :  { %v3124_v11 = vpop.eup %3123  ;;  %3143 = vrcp.f32 %v1833_v44  ;;  %v3987_v5 = vadd.f32 %v2080_v31, %v2064_v48  ;;  %v1849_v51 = vadd.f32 1.0, %v3122_v14  ;;  %v1836_v44 = vadd.f32 1.0, %v3968_v47 }
 0x3af   :  { %v3126_v27 = vpop.eup %3125  ;;  %v2083_v42 = vmul.f32 %v3124_v11, %v3866_v2  ;;  %3145 = vrcp.f32 %v1846_v58  ;;  %v2068_v47 = vmul.f32 %v3964_v26, %v3725_v25  ;;  %v2070_v58 = vmul.f32 %v3970_v6, %v3737_v32 }
 0x3b0   :  { %v3128_v28 = vpop.eup %3127  ;;  %v2082_v39 = vmul.f32 %v3126_v27, %v3868_v36  ;;  %3147 = vrcp.f32 %v1849_v51 }
 0x3b1   :  { %v3130_v1 = vpop.eup %3129  ;;  %3149 = vrcp.f32 %v1834_v16  ;;  %v3996_v50 = vadd.f32 %v2083_v42, %v2067_v12  ;;  %v1848_v56 = vadd.f32 1.0, %v3128_v28  ;;  %v2072_v28 = vmul.f32 %v3974_v3, %v3749_v40 }
 0x3b2   :  { %v3132_v63 = vpop.eup %3131  ;;  %3151 = vrcp.f32 %v1835_v10  ;;  %v3998_v4 = vadd.f32 %v2082_v39, %v2066_v59  ;;  %v1851_v2 = vadd.f32 1.0, %v3130_v1 }
 0x3b3   :  { %v3134_v7 = vpop.eup %3133  ;;  %v2085_v36 = vmul.f32 %v3132_v63, %v3876_v43  ;;  %3153 = vrcp.f32 %v1848_v56  ;;  %v2071_v43 = vmul.f32 %v3976_v54, %v3734_v30 }
 0x3b4   :  { %v3136_v24 = vpop.eup %3135  ;;  %v2084_v41 = vmul.f32 %v3134_v7, %v3878_v45  ;;  %3155 = vrcp.f32 %v1851_v2 }
 0x3b5   :  { %v3138_v15 = vpop.eup %3137  ;;  %3157 = vrcp.f32 %v1836_v44  ;;  %v4006_v0 = vadd.f32 %v2085_v36, %v2069_v19  ;;  %v1850_v37 = vadd.f32 1.0, %v3136_v24 }
 0x3b6   :  { %v3140_v61 = vpop.eup %3139  ;;  %3159 = vrcp.f32 %v1837_v17  ;;  %v4008_v48 = vadd.f32 %v2084_v41, %v2068_v47  ;;  %v1853_v23 = vadd.f32 1.0, %v3138_v15 }
 0x3b7   :  { %v3142_v34 = vpop.eup %3141  ;;  %v2087_v31 = vmul.f32 %v3140_v61, %v3886_v52  ;;  %3161 = vrcp.f32 %v1850_v37  ;;  %v4072_v37 = vld [vmem:[%s4493_s8] ss:$0 sm:$0xff] }
 0x3b8   :  { %v3144_v25 = vpop.eup %3143  ;;  %3163 = vrcp.f32 %v1853_v23  ;;  %v1852_v45 = vadd.f32 1.0, %v3142_v34 }
 0x3b9   :  { %v3146_v26 = vpop.eup %3145  ;;  %v4013_v14 = vadd.f32 %v2087_v31, %v2071_v43  ;;  %v2073_v51 = vmul.f32 %v3144_v25, %v3746_v38 }
 0x3ba   :  { %v3148_v16 = vpop.eup %3147  ;;  %v2086_v11 = vmul.f32 %v3146_v26, %v3888_v53  ;;  %3165 = vrcp.f32 %v1852_v45 }
 0x3bb   :  { %v3150_v10 = vpop.eup %3149  ;;  %v2089_v30 = vmul.f32 %v3148_v16, %v3896_v60 }
 0x3bc   :  { %v3152_v54 = vpop.eup %3151  ;;  %v4020_v52 = vadd.f32 %v2086_v11, %v2070_v58  ;;  %v2074_v56 = vmul.f32 %v3150_v10, %v3761_v49 }
 0x3bd   :  { %v3154_v27 = vpop.eup %3153  ;;  %v4022_v12 = vadd.f32 %v2089_v30, %v2073_v51  ;;  %v2075_v53 = vmul.f32 %v3152_v54, %v3758_v46 }
 0x3be   :  { %v3156_v42 = vpop.eup %3155  ;;  %v2088_v32 = vmul.f32 %v3154_v27, %v3898_v62 }
 0x3bf   :  { %v3158_v6 = vpop.eup %3157  ;;  %v2091_v59 = vmul.f32 %v3156_v42, %v3906_v8 }
 0x3c0   :  { %v3160_v38 = vpop.eup %3159  ;;  %v4029_v39 = vadd.f32 %v2088_v32, %v2072_v28  ;;  %v2076_v46 = vmul.f32 %v3158_v6, %v3773_v57 }
 0x3c1   :  { %v3162_v60 = vpop.eup %3161  ;;  %v4031_v1 = vadd.f32 %v2091_v59, %v2075_v53  ;;  %v2077_v40 = vmul.f32 %v3160_v38, %v3770_v55 }
 0x3c2   :  { %v3164_v44 = vpop.eup %3163  ;;  %v2090_v63 = vmul.f32 %v3162_v60, %v3908_v13 }
 0x3c3   :  { %v2093_v62 = vmul.f32 %v3164_v44, %v3916_v21 }
 0x3c4   :  { %v3166_v3 = vpop.eup %3165  ;;  %v4037_v17 = vadd.f32 %v2090_v63, %v2074_v56 }
 0x3c5   :  { %v4040_v8 = vadd.f32 %v2093_v62, %v2077_v40  ;;  %v2092_v2 = vmul.f32 %v3166_v3, %v3918_v29  ;;  %v4538_v40 = vld [vmem:[#allocation15_spill] sm:$0xff]  ;;  %v4539_v62 = vld [vmem:[#allocation16_spill] sm:$0xff]  ;;  %v4540_v3 = vld [vmem:[#allocation17_spill] sm:$0xff] }
 0x3c7   :  { %v4043_v7 = vadd.f32 %v2092_v2, %v2076_v46  ;;  %v4541_v46 = vld [vmem:[#allocation18_spill] sm:$0xff]  ;;  %v4542_v2 = vld [vmem:[#allocation19_spill] sm:$0xff] }
 0x3f7   :  { %v4045_v19 = vpop.f32.mrb[16].mxu1 }
 0x3f8   :  { %v4047_v49 = vpop.f32.mrb[17].mxu1  ;;  %v1377_v55 = vmul.f32 %v4045_v19, %v3697_v9 }
 0x3f9   :  { %v2982_v13 = vpack.c.bf16 %v4045_v19, %v4047_v49  ;;  %v1376_v21 = vmul.f32 %v3697_v9, %v4047_v49 }
 0x3fa   :  { %1490 = vadd.xlane.f32.xlu0 %v1377_v55  ;;  %v4543_v55 = vld [vmem:[#allocation20_spill] sm:$0xff] }
 0x3fb   :  { %1488 = vadd.xlane.f32.xlu1 %v1376_v21  ;;  %v4055_v57 = vpop.f32.mrb[18].mxu1  ;;  %2983 = vmatprep.subr.bf16.mxu0 %v2982_v13  ;;  %v4545_v21 = vld [vmem:[#allocation22_spill] sm:$0xff] }
 0x3fc   :  { %v4057_v29 = vpop.f32.mrb[19].mxu1  ;;  %2985 = vmatpush3.bf16.msra.mxu0 %v2982_v13  ;;  %v1379_v36 = vmul.f32 %v4055_v57, %v3697_v9  ;;  %v4544_v13 = vld [vmem:[#allocation21_spill] sm:$0xff] }
 0x3fd   :  { %v2986_v24 = vpack.c.bf16 %v4055_v57, %v4057_v29  ;;  %v1378_v47 = vmul.f32 %v3697_v9, %v4057_v29 }
 0x3fe   :  { %1494 = vadd.xlane.f32.xlu0 %v1379_v36  ;;  %v4546_v36 = vld [vmem:[#allocation23_spill] sm:$0xff] }
 0x3ff   :  { %1492 = vadd.xlane.f32.xlu1 %v1378_v47  ;;  %v4065_v41 = vpop.f32.mrb[20].mxu1  ;;  %2987 = vmatprep.subr.bf16.mxu0 %v2986_v24  ;;  %v4548_v47 = vld [vmem:[#allocation25_spill] sm:$0xff] }
 0x400   :  { %v4067_v15 = vpop.f32.mrb[21].mxu1  ;;  %2989 = vmatpush3.bf16.msra.mxu0 %v2986_v24  ;;  %v1381_v61 = vmul.f32 %v4072_v37, %v4065_v41  ;;  %v4547_v24 = vld [vmem:[#allocation24_spill] sm:$0xff] }
 0x401   :  { %v2990_v23 = vpack.c.bf16 %v4065_v41, %v4067_v15  ;;  %v1380_v9 = vmul.f32 %v4072_v37, %v4067_v15 }
 0x402   :  { %1498 = vadd.xlane.f32.xlu0 %v1381_v61  ;;  %v1487_v61 = vpop.xlane.xlu0 %1486 }
 0x403   :  { %1496 = vadd.xlane.f32.xlu1 %v1380_v9  ;;  %v4080_v34 = vpop.f32.mrb[22].mxu1  ;;  %2991 = vmatprep.subr.bf16.mxu0 %v2990_v23 }
 0x404   :  { %v4082_v43 = vpop.f32.mrb[23].mxu1  ;;  %2993 = vmatpush3.bf16.msra.mxu0 %v2990_v23  ;;  %v1383_v31 = vmul.f32 %v4072_v37, %v4080_v34  ;;  %v1485_v23 = vpop.xlane.xlu1 %1484 }
 0x405   :  { %v2994_v25 = vpack.c.bf16 %v4080_v34, %v4082_v43  ;;  %v1382_v45 = vmul.f32 %v4072_v37, %v4082_v43 }
 0x406   :  { %1502 = vadd.xlane.f32.xlu0 %v1383_v31 }
 0x407   :  { %1500 = vadd.xlane.f32.xlu1 %v1382_v45  ;;  %v4090_v26 = vpop.f32.mrb[24].mxu1  ;;  %2995 = vmatprep.subr.bf16.mxu0 %v2994_v25 }
 0x408   :  { %v4092_v16 = vpop.f32.mrb[25].mxu1  ;;  %2997 = vmatpush3.bf16.msra.mxu0 %v2994_v25  ;;  %v1385_v58 = vmul.f32 %v4072_v37, %v4090_v26 }
 0x409   :  { %v2998_v11 = vpack.c.bf16 %v4090_v26, %v4092_v16  ;;  %v1384_v10 = vmul.f32 %v4072_v37, %v4092_v16 }
 0x40a   :  { %1506 = vadd.xlane.f32.xlu0 %v1385_v58 }
 0x40b   :  { %1504 = vadd.xlane.f32.xlu1 %v1384_v10  ;;  %v4100_v51 = vpop.f32.mrb[26].mxu1  ;;  %2999 = vmatprep.subr.bf16.mxu0 %v2998_v11 }
 0x40c   :  { %v4102_v30 = vpop.f32.mrb[27].mxu1  ;;  %3001 = vmatpush3.bf16.msra.mxu0 %v2998_v11  ;;  %v1387_v54 = vmul.f32 %v4072_v37, %v4100_v51  ;;  %v4549_v11 = vld [vmem:[#allocation29_spill] sm:$0xff] }
 0x40d   :  { %v3002_v27 = vpack.c.bf16 %v4100_v51, %v4102_v30  ;;  %v1386_v42 = vmul.f32 %v4072_v37, %v4102_v30  ;;  %v2260_v10 = vmul.f32 -1.442695, %v4549_v11 }
 0x40e   :  { %1510 = vadd.xlane.f32.xlu0 %v1387_v54 }
 0x40f   :  { %1508 = vadd.xlane.f32.xlu1 %v1386_v42  ;;  %v4110_v28 = vpop.f32.mrb[28].mxu1  ;;  %3003 = vmatprep.subr.bf16.mxu0 %v3002_v27  ;;  %v4550_v42 = vld [vmem:[#allocation28_spill] sm:$0xff] }
 0x410   :  { %v4112_v32 = vpop.f32.mrb[29].mxu1  ;;  %3005 = vmatpush3.bf16.msra.mxu0 %v3002_v27  ;;  %v1389_v6 = vmul.f32 %v4072_v37, %v4110_v28 }
 0x411   :  { %v3006_v53 = vpack.c.bf16 %v4110_v28, %v4112_v32  ;;  %v1388_v59 = vmul.f32 %v4072_v37, %v4112_v32 }
 0x412   :  { %1514 = vadd.xlane.f32.xlu0 %v1389_v6  ;;  %v2261_v6 = vmul.f32 -1.442695, %v4550_v42 }
 0x413   :  { %1512 = vadd.xlane.f32.xlu1 %v1388_v59  ;;  %v4120_v38 = vpop.f32.mrb[30].mxu1  ;;  %3007 = vmatprep.subr.bf16.mxu0 %v3006_v53 }
 0x414   :  { %v4122_v60 = vpop.f32.mrb[31].mxu1  ;;  %3009 = vmatpush3.bf16.msra.mxu0 %v3006_v53  ;;  %v1391_v44 = vmul.f32 %v4072_v37, %v4120_v38 }
 0x415   :  { %v3010_v56 = vpack.c.bf16 %v4120_v38, %v4122_v60  ;;  %v1390_v63 = vmul.f32 %v4072_v37, %v4122_v60 }
 0x416   :  { %1518 = vadd.xlane.f32.xlu0 %v1391_v44  ;;  %v2277_v44 = vmul.f32 -1.442695, %v1487_v61 }
 0x417   :  { %1516 = vadd.xlane.f32.xlu1 %v1390_v63  ;;  %3011 = vmatprep.subr.bf16.mxu0 %v3010_v56 }
 0x418   :  { %3013 = vmatpush3.bf16.msra.mxu0 %v3010_v56 }
 0x41b   :  { %2775 = vmatmul.mubr.f32.vlgmr.msra.gmra.mrb[32].mxu0 %v3799_v22 }
 0x41c   :  { %2777 = vmatprep.mubr.f32.mxu0 %v3794_v20 }
 0x41f   :  { %2778 = vmatmul.mubr.f32.gmra.mrb[34].mxu0 %v3804_v33 }
 0x420   :  { %2780 = vmatprep.mubr.f32.mxu0 %v3807_v35 }
 0x423   :  { %2781 = vmatmul.mubr.f32.gmra.mrb[36].mxu0 %v4538_v40 }
 0x424   :  { %2783 = vmatprep.mubr.f32.mxu0 %v4539_v62 }
 0x427   :  { %2784 = vmatmul.mubr.f32.gmra.mrb[38].mxu0 %v4540_v3 }
 0x428   :  { %2786 = vmatprep.mubr.f32.mxu0 %v4541_v46 }
 0x42b   :  { %2787 = vmatmul.mubr.f32.gmra.mrb[40].mxu0 %v4542_v2 }
 0x42c   :  { %2789 = vmatprep.mubr.f32.mxu0 %v4543_v55 }
 0x42f   :  { %2790 = vmatmul.mubr.f32.gmra.mrb[42].mxu0 %v4544_v13 }
 0x430   :  { %2792 = vmatprep.mubr.f32.mxu0 %v4545_v21 }
 0x433   :  { %2793 = vmatmul.mubr.f32.gmra.mrb[44].mxu0 %v4546_v36 }
 0x434   :  { %2795 = vmatprep.mubr.f32.mxu0 %v4547_v24 }
 0x437   :  { %2796 = vmatmul.mubr.f32.gmra.mrb[46].mxu0 %v4548_v47 }
 0x487   :  { %v1491_v9 = vpop.xlane.xlu0 %1490 }
 0x488   :  { %v2279_v31 = vmul.f32 -1.442695, %v1491_v9  ;;  %v1489_v25 = vpop.xlane.xlu1 %1488  ;;  %v2276_v9 = vmul.f32 -1.442695, %v1485_v23 }
 0x489   :  { %v2278_v45 = vmul.f32 -1.442695, %v1489_v25 }
 0x48a   :  { %3167 = vpow2.f32 %v2279_v31 }
 0x48b   :  { %3169 = vpow2.f32 %v2278_v45  ;;  %v1495_v58 = vpop.xlane.xlu0 %1494 }
 0x48c   :  { %v2281_v54 = vmul.f32 -1.442695, %v1495_v58  ;;  %v1493_v27 = vpop.xlane.xlu1 %1492 }
 0x48d   :  { %v2280_v53 = vmul.f32 -1.442695, %v1493_v27 }
 0x48e   :  { %3171 = vpow2.f32 %v2281_v54 }
 0x48f   :  { %3173 = vpow2.f32 %v2280_v53  ;;  %v1499_v59 = vpop.xlane.xlu0 %1498 }
 0x490   :  { %3175 = vpow2.f32 %v2260_v10  ;;  %v2283_v56 = vmul.f32 -1.442695, %v1499_v59  ;;  %v1497_v63 = vpop.xlane.xlu1 %1496 }
 0x491   :  { %3177 = vpow2.f32 %v2261_v6  ;;  %v2282_v25 = vmul.f32 -1.442695, %v1497_v63 }
 0x492   :  { %3179 = vpow2.f32 %v2283_v56 }
 0x493   :  { %3181 = vpow2.f32 %v2282_v25  ;;  %v1503_v31 = vpop.xlane.xlu0 %1502 }
 0x494   :  { %v3168_v45 = vpop.eup %3167  ;;  %3183 = vpow2.f32 %v2277_v44  ;;  %v2285_v58 = vmul.f32 -1.442695, %v1503_v31  ;;  %v1501_v11 = vpop.xlane.xlu1 %1500 }
 0x495   :  { %v3170_v47 = vpop.eup %3169  ;;  %3185 = vpow2.f32 %v2276_v9  ;;  %v1857_v27 = vadd.f32 1.0, %v3168_v45  ;;  %v2284_v54 = vmul.f32 -1.442695, %v1501_v11 }
 0x496   :  { %v1856_v42 = vadd.f32 1.0, %v3170_v47  ;;  %3187 = vpow2.f32 %v2285_v58 }
 0x497   :  { %3189 = vrcp.f32 %v1857_v27  ;;  %v1507_v61 = vpop.xlane.xlu0 %1506 }
 0x498   :  { %v3172_v10 = vpop.eup %3171  ;;  %3191 = vrcp.f32 %v1856_v42  ;;  %v2287_v6 = vmul.f32 -1.442695, %v1507_v61  ;;  %v1505_v23 = vpop.xlane.xlu1 %1504 }
 0x499   :  { %v3174_v53 = vpop.eup %3173  ;;  %v1859_v59 = vadd.f32 1.0, %v3172_v10  ;;  %3193 = vpow2.f32 %v2284_v54  ;;  %v2286_v56 = vmul.f32 -1.442695, %v1505_v23 }
 0x49a   :  { %v4147_v63 = vpop.eup %3175  ;;  %v1858_v44 = vadd.f32 1.0, %v3174_v53  ;;  %3195 = vpow2.f32 %v2287_v6 }
 0x49b   :  { %v3178_v25 = vpop.eup %3177  ;;  %3197 = vrcp.f32 %v1859_v59  ;;  %v1511_v9 = vpop.xlane.xlu0 %1510 }
 0x49c   :  { %v3180_v31 = vpop.eup %3179  ;;  %3199 = vrcp.f32 %v1858_v44  ;;  %v2289_v47 = vmul.f32 -1.442695, %v1511_v9  ;;  %v1509_v45 = vpop.xlane.xlu1 %1508 }
 0x49d   :  { %v3182_v58 = vpop.eup %3181  ;;  %v1861_v11 = vadd.f32 1.0, %v3180_v31  ;;  %3201 = vpow2.f32 %v2286_v56  ;;  %v2288_v27 = vmul.f32 -1.442695, %v1509_v45 }
 0x49e   :  { %v3184_v42 = vpop.eup %3183  ;;  %v1860_v61 = vadd.f32 1.0, %v3182_v58  ;;  %3203 = vpow2.f32 %v2289_v47 }
 0x49f   :  { %v3186_v54 = vpop.eup %3185  ;;  %3205 = vrcp.f32 %v1861_v11  ;;  %v1515_v10 = vpop.xlane.xlu0 %1514 }
 0x4a0   :  { %v3188_v23 = vpop.eup %3187  ;;  %3207 = vrcp.f32 %v1860_v61  ;;  %v2291_v6 = vmul.f32 -1.442695, %v1515_v10  ;;  %v1513_v53 = vpop.xlane.xlu1 %1512 }
 0x4a1   :  { %v3190_v59 = vpop.eup %3189  ;;  %v1863_v24 = vadd.f32 1.0, %v3188_v23  ;;  %3209 = vpow2.f32 %v2288_v27  ;;  %v2290_v44 = vmul.f32 -1.442695, %v1513_v53 }
 0x4a2   :  { %v3192_v9 = vpop.eup %3191  ;;  %v2097_v36 = vmul.f32 %v3190_v59, %v4045_v19  ;;  %3211 = vpow2.f32 %v2291_v6 }
 0x4a3   :  { %v3194_v56 = vpop.eup %3193  ;;  %v2096_v31 = vmul.f32 %v3192_v9, %v4047_v49  ;;  %3213 = vrcp.f32 %v1863_v24  ;;  %v1519_v47 = vpop.xlane.xlu0 %1518 }
 0x4a4   :  { %v3196_v45 = vpop.eup %3195  ;;  %v4152_v58 = vadd.f32 %v3985_v18, %v2097_v36  ;;  %v1862_v11 = vadd.f32 1.0, %v3194_v56  ;;  %3215 = vpow2.f32 %v2290_v44  ;;  %v2293_v61 = vmul.f32 -1.442695, %v1519_v47  ;;  %v1517_v10 = vpop.xlane.xlu1 %1516 }
 0x4a5   :  { %v3198_v23 = vpop.eup %3197  ;;  %v4155_v27 = vadd.f32 %v3987_v5, %v2096_v31  ;;  %v1865_v53 = vadd.f32 1.0, %v3196_v45  ;;  %v2292_v19 = vmul.f32 -1.442695, %v1517_v10  ;;  %v1839_v36 = vadd.f32 1.0, %v3178_v25 }
 0x4a6   :  { %v3200_v6 = vpop.eup %3199  ;;  %v2099_v59 = vmul.f32 %v3198_v23, %v4055_v57  ;;  %3217 = vrcp.f32 %v1862_v11  ;;  %v1855_v5 = vadd.f32 1.0, %v3184_v42 }
 0x4a7   :  { %v3202_v49 = vpop.eup %3201  ;;  %v2098_v24 = vmul.f32 %v3200_v6, %v4057_v29  ;;  %3219 = vrcp.f32 %v1865_v53 }
 0x4a8   :  { %v3204_v18 = vpop.eup %3203  ;;  %v4160_v44 = vadd.f32 %v3996_v50, %v2099_v59  ;;  %v1864_v9 = vadd.f32 1.0, %v3202_v49  ;;  %3221 = vpow2.f32 %v2293_v61  ;;  %v1854_v50 = vadd.f32 1.0, %v3186_v54 }
 0x4a9   :  { %v3206_v56 = vpop.eup %3205  ;;  %v4163_v31 = vadd.f32 %v3998_v4, %v2098_v24  ;;  %v1867_v47 = vadd.f32 1.0, %v3204_v18  ;;  %3223 = vpow2.f32 %v2292_v19 }
 0x4aa   :  { %v3208_v57 = vpop.eup %3207  ;;  %v2101_v45 = vmul.f32 %v3206_v56, %v4065_v41  ;;  %3225 = vrcp.f32 %v1864_v9  ;;  %v1838_v41 = vadd.f32 1.0, %v4147_v63 }
 0x4ab   :  { %v3210_v29 = vpop.eup %3209  ;;  %v2100_v11 = vmul.f32 %v3208_v57, %v4067_v15  ;;  %3227 = vrcp.f32 %v1867_v47 }
 0x4ac   :  { %v3212_v25 = vpop.eup %3211  ;;  %3229 = vrcp.f32 %v1839_v36  ;;  %v4168_v61 = vadd.f32 %v4006_v0, %v2101_v45  ;;  %v1866_v42 = vadd.f32 1.0, %v3210_v29 }
 0x4ad   :  { %v3214_v10 = vpop.eup %3213  ;;  %3231 = vrcp.f32 %v1855_v5  ;;  %v4171_v4 = vadd.f32 %v4008_v48, %v2100_v11  ;;  %v1869_v23 = vadd.f32 1.0, %v3212_v25 }
 0x4ae   :  { %v3216_v53 = vpop.eup %3215  ;;  %v2103_v19 = vmul.f32 %v3214_v10, %v4080_v34  ;;  %3233 = vrcp.f32 %v1866_v42 }
 0x4af   :  { %3235 = vrcp.f32 %v1869_v23  ;;  %v1868_v15 = vadd.f32 1.0, %v3216_v53  ;;  %v4553_v53 = vld [vmem:[#allocation13_spill] sm:$0xff] }
 0x4b0   :  { %v3218_v6 = vpop.eup %3217  ;;  %3237 = vrcp.f32 %v1854_v50  ;;  %v4176_v0 = vadd.f32 %v4013_v14, %v2103_v19  ;;  %v4551_v50 = vld [vmem:[#allocation26_spill] sm:$0xff] }
 0x4b1   :  { %v3220_v54 = vpop.eup %3219  ;;  %v2102_v59 = vmul.f32 %v3218_v6, %v4082_v43  ;;  %3239 = vrcp.f32 %v1868_v15  ;;  %v4554_v19 = vld [vmem:[#allocation14_spill] sm:$0xff] }
 0x4b2   :  { %v3222_v48 = vpop.eup %3221  ;;  %3241 = vrcp.f32 %v1838_v41  ;;  %v2105_v49 = vmul.f32 %v3220_v54, %v4090_v26 }
 0x4b3   :  { %v3224_v24 = vpop.eup %3223  ;;  %v4181_v63 = vadd.f32 %v4020_v52, %v2102_v59  ;;  %v1871_v34 = vadd.f32 1.0, %v3222_v48 }
 0x4b4   :  { %v3226_v18 = vpop.eup %3225  ;;  %v4184_v36 = vadd.f32 %v4022_v12, %v2105_v49  ;;  %v1870_v9 = vadd.f32 1.0, %v3224_v24 }
 0x4b5   :  { %v3228_v14 = vpop.eup %3227  ;;  %v2104_v56 = vmul.f32 %v3226_v18, %v4092_v16  ;;  %3243 = vrcp.f32 %v1871_v34 }
 0x4b6   :  { %v3230_v43 = vpop.eup %3229  ;;  %v2107_v5 = vmul.f32 %v3228_v14, %v4100_v51  ;;  %3245 = vrcp.f32 %v1870_v9 }
 0x4b7   :  { %v3232_v47 = vpop.eup %3231  ;;  %v4189_v26 = vadd.f32 %v4029_v39, %v2104_v56  ;;  %v2079_v41 = vmul.f32 %v3230_v43, %v4553_v53 }
 0x4b8   :  { %v3234_v52 = vpop.eup %3233  ;;  %v4192_v57 = vadd.f32 %v4031_v1, %v2107_v5  ;;  %v2095_v42 = vmul.f32 %v3232_v47, %v4551_v50  ;;  %v4552_v1 = vld [vmem:[#allocation27_spill] sm:$0xff] }
 0x4b9   :  { %v3236_v45 = vpop.eup %3235  ;;  %v2106_v12 = vmul.f32 %v3234_v52, %v4102_v30 }
 0x4ba   :  { %v3238_v29 = vpop.eup %3237  ;;  %v2109_v11 = vmul.f32 %v3236_v45, %v4110_v28  ;;  %v2204_v6 = vadd.f32 %v2095_v42, %v2079_v41 }
 0x4bb   :  { %v3240_v16 = vpop.eup %3239  ;;  %v4197_v25 = vadd.f32 %v4037_v17, %v2106_v12  ;;  %v2094_v23 = vmul.f32 %v3238_v29, %v4552_v1 }
 0x4bc   :  { %v3242_v51 = vpop.eup %3241  ;;  %v4201_v39 = vadd.f32 %v4040_v8, %v2109_v11  ;;  %v2108_v10 = vmul.f32 %v3240_v16, %v4112_v32 }
 0x4bd   :  { %v2078_v15 = vmul.f32 %v3242_v51, %v4554_v19 }
 0x4be   :  { %v4207_v30 = vadd.f32 %v4043_v7, %v2108_v10 }
 0x4bf   :  { %v3244_v28 = vpop.eup %3243  ;;  %v2200_v59 = vadd.f32 %v2094_v23, %v2078_v15 }
 0x4c0   :  { %v3246_v17 = vpop.eup %3245  ;;  %v2111_v54 = vmul.f32 %v3244_v28, %v4120_v38 }
 0x4c1   :  { %v2110_v8 = vmul.f32 %v3246_v17, %v4122_v60 }
 0x4c2   :  { %v4212_v48 = vadd.f32 %v2204_v6, %v2111_v54 }
 0x4c3   :  { %v4214_v32 = vadd.f32 %v2200_v59, %v2110_v8 }
 0x4ee   :  { %v4216_v49 = vpop.f32.mrb[32].mxu0 }
 0x4ef   :  { %v4218_v24 = vpop.f32.mrb[33].mxu0  ;;  %v1393_v7 = vmul.f32 %v4072_v37, %v4216_v49 }
 0x4f0   :  { %v3014_v34 = vpack.c.bf16 %v4216_v49, %v4218_v24  ;;  %v1392_v38 = vmul.f32 %v4072_v37, %v4218_v24 }
 0x4f1   :  { %1522 = vadd.xlane.f32.xlu0 %v1393_v7 }
 0x4f2   :  { %1520 = vadd.xlane.f32.xlu1 %v1392_v38  ;;  %v4226_v60 = vpop.f32.mrb[34].mxu0  ;;  %3015 = vmatprep.subr.bf16.mxu1 %v3014_v34 }
 0x4f3   :  { %v4228_v18 = vpop.f32.mrb[35].mxu0  ;;  %3017 = vmatpush3.bf16.msra.mxu1 %v3014_v34  ;;  %v1395_v9 = vmul.f32 %v4072_v37, %v4226_v60 }
 0x4f4   :  { %v3018_v14 = vpack.c.bf16 %v4226_v60, %v4228_v18  ;;  %v1394_v56 = vmul.f32 %v4072_v37, %v4228_v18 }
 0x4f5   :  { %1526 = vadd.xlane.f32.xlu0 %v1395_v9 }
 0x4f6   :  { %1524 = vadd.xlane.f32.xlu1 %v1394_v56  ;;  %v4236_v43 = vpop.f32.mrb[36].mxu0  ;;  %3019 = vmatprep.subr.bf16.mxu1 %v3018_v14 }
 0x4f7   :  { %v4238_v5 = vpop.f32.mrb[37].mxu0  ;;  %3021 = vmatpush3.bf16.msra.mxu1 %v3018_v14  ;;  %v1397_v47 = vmul.f32 %v4072_v37, %v4236_v43 }
 0x4f8   :  { %v3022_v52 = vpack.c.bf16 %v4236_v43, %v4238_v5  ;;  %v1396_v45 = vmul.f32 %v4072_v37, %v4238_v5 }
 0x4f9   :  { %1530 = vadd.xlane.f32.xlu0 %v1397_v47 }
 0x4fa   :  { %1528 = vadd.xlane.f32.xlu1 %v1396_v45  ;;  %v4246_v12 = vpop.f32.mrb[38].mxu0  ;;  %3023 = vmatprep.subr.bf16.mxu1 %v3022_v52 }
 0x4fb   :  { %v4248_v29 = vpop.f32.mrb[39].mxu0  ;;  %3025 = vmatpush3.bf16.msra.mxu1 %v3022_v52  ;;  %v1399_v11 = vmul.f32 %v4072_v37, %v4246_v12 }
 0x4fc   :  { %v3026_v16 = vpack.c.bf16 %v4246_v12, %v4248_v29  ;;  %v1398_v51 = vmul.f32 %v4072_v37, %v4248_v29 }
 0x4fd   :  { %1534 = vadd.xlane.f32.xlu0 %v1399_v11 }
 0x4fe   :  { %1532 = vadd.xlane.f32.xlu1 %v1398_v51  ;;  %v4256_v50 = vpop.f32.mrb[40].mxu0  ;;  %3027 = vmatprep.subr.bf16.mxu1 %v3026_v16 }
 0x4ff   :  { %v4258_v42 = vpop.f32.mrb[41].mxu0  ;;  %3029 = vmatpush3.bf16.msra.mxu1 %v3026_v16  ;;  %v1401_v10 = vmul.f32 %v4072_v37, %v4256_v50 }
 0x500   :  { %v3030_v1 = vpack.c.bf16 %v4256_v50, %v4258_v42  ;;  %v1400_v23 = vmul.f32 %v4072_v37, %v4258_v42 }
 0x501   :  { %1538 = vadd.xlane.f32.xlu0 %v1401_v10 }
 0x502   :  { %1536 = vadd.xlane.f32.xlu1 %v1400_v23  ;;  %v4266_v53 = vpop.f32.mrb[42].mxu0  ;;  %3031 = vmatprep.subr.bf16.mxu1 %v3030_v1 }
 0x503   :  { %v4268_v41 = vpop.f32.mrb[43].mxu0  ;;  %3033 = vmatpush3.bf16.msra.mxu1 %v3030_v1  ;;  %v1403_v28 = vmul.f32 %v4072_v37, %v4266_v53 }
 0x504   :  { %v3034_v19 = vpack.c.bf16 %v4266_v53, %v4268_v41  ;;  %v1402_v15 = vmul.f32 %v4072_v37, %v4268_v41 }
 0x505   :  { %1542 = vadd.xlane.f32.xlu0 %v1403_v28 }
 0x506   :  { %1540 = vadd.xlane.f32.xlu1 %v1402_v15  ;;  %v4276_v17 = vpop.f32.mrb[44].mxu0  ;;  %3035 = vmatprep.subr.bf16.mxu1 %v3034_v19 }
 0x507   :  { %v4278_v6 = vpop.f32.mrb[45].mxu0  ;;  %3037 = vmatpush3.bf16.msra.mxu1 %v3034_v19  ;;  %v1405_v54 = vmul.f32 %v4072_v37, %v4276_v17 }
 0x508   :  { %v3038_v59 = vpack.c.bf16 %v4276_v17, %v4278_v6  ;;  %v1404_v8 = vmul.f32 %v4072_v37, %v4278_v6 }
 0x509   :  { %1546 = vadd.xlane.f32.xlu0 %v1405_v54 }
 0x50a   :  { %1544 = vadd.xlane.f32.xlu1 %v1404_v8  ;;  %v4286_v7 = vpop.f32.mrb[46].mxu0  ;;  %3039 = vmatprep.subr.bf16.mxu1 %v3038_v59 }
 0x50b   :  { %v4288_v34 = vpop.f32.mrb[47].mxu0  ;;  %3041 = vmatpush3.bf16.msra.mxu1 %v3038_v59  ;;  %v1407_v38 = vmul.f32 %v4072_v37, %v4286_v7 }
 0x50c   :  { %v3042_v9 = vpack.c.bf16 %v4286_v7, %v4288_v34  ;;  %v1406_v14 = vmul.f32 %v4072_v37, %v4288_v34 }
 0x50d   :  { %1550 = vadd.xlane.f32.xlu0 %v1407_v38 }
 0x50e   :  { %1548 = vadd.xlane.f32.xlu1 %v1406_v14  ;;  %3043 = vmatprep.subr.bf16.mxu1 %v3042_v9 }
 0x50f   :  { %3045 = vmatpush3.bf16.msra.mxu1 %v3042_v9 }
 0x512   :  { %2831 = vmatmul.mubr.f32.vlgmr.msra.gmra.mrb[32].mxu1 %v3799_v22  ;;  %v4556_v22 = vld [vmem:[#allocation24_spill] sm:$0xff] }
 0x513   :  { %2833 = vmatprep.mubr.f32.mxu1 %v3794_v20  ;;  %v4555_v20 = vld [vmem:[#allocation23_spill] sm:$0xff] }
 0x516   :  { %2834 = vmatmul.mubr.f32.gmra.mrb[34].mxu1 %v3804_v33  ;;  %v4557_v33 = vld [vmem:[#allocation25_spill] sm:$0xff] }
 0x517   :  { %2836 = vmatprep.mubr.f32.mxu1 %v3807_v35 }
 0x51a   :  { %2837 = vmatmul.mubr.f32.gmra.mrb[36].mxu1 %v4538_v40 }
 0x51b   :  { %2839 = vmatprep.mubr.f32.mxu1 %v4539_v62 }
 0x51e   :  { %2840 = vmatmul.mubr.f32.gmra.mrb[38].mxu1 %v4540_v3 }
 0x51f   :  { %2842 = vmatprep.mubr.f32.mxu1 %v4541_v46 }
 0x522   :  { %2843 = vmatmul.mubr.f32.gmra.mrb[40].mxu1 %v4542_v2 }
 0x523   :  { %2845 = vmatprep.mubr.f32.mxu1 %v4543_v55 }
 0x526   :  { %2846 = vmatmul.mubr.f32.gmra.mrb[42].mxu1 %v4544_v13 }
 0x527   :  { %2848 = vmatprep.mubr.f32.mxu1 %v4545_v21 }
 0x52a   :  { %2849 = vmatmul.mubr.f32.gmra.mrb[44].mxu1 %v4555_v20 }
 0x52b   :  { %2851 = vmatprep.mubr.f32.mxu1 %v4556_v22 }
 0x52e   :  { %2852 = vmatmul.mubr.f32.gmra.mrb[46].mxu1 %v4557_v33 }
 0x57e   :  { %v1523_v35 = vpop.xlane.xlu0 %1522 }
 0x57f   :  { %v2295_v40 = vmul.f32 -1.442695, %v1523_v35  ;;  %v1521_v62 = vpop.xlane.xlu1 %1520 }
 0x580   :  { %v2294_v3 = vmul.f32 -1.442695, %v1521_v62 }
 0x581   :  { %3247 = vpow2.f32 %v2295_v40 }
 0x582   :  { %3249 = vpow2.f32 %v2294_v3  ;;  %v1527_v46 = vpop.xlane.xlu0 %1526 }
 0x583   :  { %v2297_v2 = vmul.f32 -1.442695, %v1527_v46  ;;  %v1525_v56 = vpop.xlane.xlu1 %1524 }
 0x584   :  { %v2296_v55 = vmul.f32 -1.442695, %v1525_v56 }
 0x585   :  { %3251 = vpow2.f32 %v2297_v2 }
 0x586   :  { %3253 = vpow2.f32 %v2296_v55  ;;  %v1531_v13 = vpop.xlane.xlu0 %1530 }
 0x587   :  { %v2299_v21 = vmul.f32 -1.442695, %v1531_v13  ;;  %v1529_v47 = vpop.xlane.xlu1 %1528 }
 0x588   :  { %v2298_v52 = vmul.f32 -1.442695, %v1529_v47 }
 0x589   :  { %3255 = vpow2.f32 %v2299_v21 }
 0x58a   :  { %3257 = vpow2.f32 %v2298_v52  ;;  %v1535_v45 = vpop.xlane.xlu0 %1534 }
 0x58b   :  { %v3248_v11 = vpop.eup %3247  ;;  %v2301_v16 = vmul.f32 -1.442695, %v1535_v45  ;;  %v1533_v51 = vpop.xlane.xlu1 %1532 }
 0x58c   :  { %v3250_v10 = vpop.eup %3249  ;;  %v1873_v1 = vadd.f32 1.0, %v3248_v11  ;;  %v2300_v23 = vmul.f32 -1.442695, %v1533_v51 }
 0x58d   :  { %v1872_v28 = vadd.f32 1.0, %v3250_v10  ;;  %3259 = vpow2.f32 %v2301_v16 }
 0x58e   :  { %3261 = vrcp.f32 %v1873_v1  ;;  %v1539_v19 = vpop.xlane.xlu0 %1538 }
 0x58f   :  { %v3252_v15 = vpop.eup %3251  ;;  %3263 = vrcp.f32 %v1872_v28  ;;  %v2303_v54 = vmul.f32 -1.442695, %v1539_v19  ;;  %v1537_v59 = vpop.xlane.xlu1 %1536 }
 0x590   :  { %v3254_v8 = vpop.eup %3253  ;;  %v1875_v38 = vadd.f32 1.0, %v3252_v15  ;;  %3265 = vpow2.f32 %v2300_v23  ;;  %v2302_v9 = vmul.f32 -1.442695, %v1537_v59 }
 0x591   :  { %v1874_v14 = vadd.f32 1.0, %v3254_v8  ;;  %3267 = vpow2.f32 %v2303_v54 }
 0x592   :  { %3269 = vrcp.f32 %v1875_v38  ;;  %v1543_v20 = vpop.xlane.xlu0 %1542 }
 0x593   :  { %v3256_v22 = vpop.eup %3255  ;;  %3271 = vrcp.f32 %v1874_v14  ;;  %v2305_v33 = vmul.f32 -1.442695, %v1543_v20  ;;  %v1541_v35 = vpop.xlane.xlu1 %1540 }
 0x594   :  { %v3258_v40 = vpop.eup %3257  ;;  %v1877_v62 = vadd.f32 1.0, %v3256_v22  ;;  %3273 = vpow2.f32 %v2302_v9  ;;  %v2304_v3 = vmul.f32 -1.442695, %v1541_v35 }
 0x595   :  { %v1876_v46 = vadd.f32 1.0, %v3258_v40  ;;  %3275 = vpow2.f32 %v2305_v33 }
 0x596   :  { %3277 = vrcp.f32 %v1877_v62  ;;  %v1547_v2 = vpop.xlane.xlu0 %1546 }
 0x597   :  { %v3260_v56 = vpop.eup %3259  ;;  %3279 = vrcp.f32 %v1876_v46  ;;  %v2307_v55 = vmul.f32 -1.442695, %v1547_v2  ;;  %v1545_v13 = vpop.xlane.xlu1 %1544 }
 0x598   :  { %v3262_v21 = vpop.eup %3261  ;;  %v1879_v47 = vadd.f32 1.0, %v3260_v56  ;;  %3281 = vpow2.f32 %v2304_v3  ;;  %v2306_v52 = vmul.f32 -1.442695, %v1545_v13 }
 0x599   :  { %v3264_v45 = vpop.eup %3263  ;;  %v2113_v11 = vmul.f32 %v3262_v21, %v4216_v49  ;;  %3283 = vpow2.f32 %v2307_v55 }
 0x59a   :  { %v3266_v16 = vpop.eup %3265  ;;  %v2112_v51 = vmul.f32 %v3264_v45, %v4218_v24  ;;  %3285 = vrcp.f32 %v1879_v47  ;;  %v1551_v10 = vpop.xlane.xlu0 %1550 }
 0x59b   :  { %v3268_v1 = vpop.eup %3267  ;;  %v4314_v23 = vadd.f32 %v4152_v58, %v2113_v11  ;;  %v1878_v28 = vadd.f32 1.0, %v3266_v16  ;;  %3287 = vpow2.f32 %v2306_v52  ;;  %v2309_v19 = vmul.f32 -1.442695, %v1551_v10  ;;  %v1549_v15 = vpop.xlane.xlu1 %1548 }
 0x59c   :  { %v3270_v54 = vpop.eup %3269  ;;  %v4317_v59 = vadd.f32 %v4155_v27, %v2112_v51  ;;  %v1881_v8 = vadd.f32 1.0, %v3268_v1  ;;  %v2308_v49 = vmul.f32 -1.442695, %v1549_v15 }
 0x59d   :  { %v3272_v38 = vpop.eup %3271  ;;  %v2115_v9 = vmul.f32 %v3270_v54, %v4226_v60  ;;  %3289 = vrcp.f32 %v1878_v28 }
 0x59e   :  { %v3274_v24 = vpop.eup %3273  ;;  %v2114_v14 = vmul.f32 %v3272_v38, %v4228_v18  ;;  %3291 = vrcp.f32 %v1881_v8 }
 0x59f   :  { %v3276_v58 = vpop.eup %3275  ;;  %v4322_v20 = vadd.f32 %v4160_v44, %v2115_v9  ;;  %v1880_v22 = vadd.f32 1.0, %v3274_v24  ;;  %3293 = vpow2.f32 %v2309_v19 }
 0x5a0   :  { %v3278_v33 = vpop.eup %3277  ;;  %v4325_v27 = vadd.f32 %v4163_v31, %v2114_v14  ;;  %v1883_v35 = vadd.f32 1.0, %v3276_v58  ;;  %3295 = vpow2.f32 %v2308_v49 }
 0x5a1   :  { %v3280_v40 = vpop.eup %3279  ;;  %v2117_v60 = vmul.f32 %v3278_v33, %v4236_v43  ;;  %3297 = vrcp.f32 %v1880_v22 }
 0x5a2   :  { %v3282_v62 = vpop.eup %3281  ;;  %v2116_v18 = vmul.f32 %v3280_v40, %v4238_v5  ;;  %3299 = vrcp.f32 %v1883_v35 }
 0x5a3   :  { %v3284_v3 = vpop.eup %3283  ;;  %v4330_v44 = vadd.f32 %v4168_v61, %v2117_v60  ;;  %v1882_v46 = vadd.f32 1.0, %v3282_v62 }
 0x5a4   :  { %v3286_v2 = vpop.eup %3285  ;;  %v4333_v56 = vadd.f32 %v4171_v4, %v2116_v18  ;;  %v1885_v31 = vadd.f32 1.0, %v3284_v3 }
 0x5a5   :  { %v3288_v55 = vpop.eup %3287  ;;  %v2119_v13 = vmul.f32 %v3286_v2, %v4246_v12  ;;  %3301 = vrcp.f32 %v1882_v46 }
 0x5a6   :  { %3303 = vrcp.f32 %v1885_v31  ;;  %v1884_v43 = vadd.f32 1.0, %v3288_v55 }
 0x5a7   :  { %v3290_v21 = vpop.eup %3289  ;;  %v4337_v5 = vadd.f32 %v4176_v0, %v2119_v13 }
 0x5a8   :  { %v3292_v47 = vpop.eup %3291  ;;  %v2118_v61 = vmul.f32 %v3290_v21, %v4248_v29  ;;  %3305 = vrcp.f32 %v1884_v43 }
 0x5a9   :  { %v3294_v52 = vpop.eup %3293  ;;  %v2121_v45 = vmul.f32 %v3292_v47, %v4256_v50  ;;  %v3376_v47 = vld [vmem:[%s4493_s8] ss:$0 sm:$0xff]  ;;  %s3477_s8 = smov [#allocation9]  }
 0x5aa   :  { %v3296_v4 = vpop.eup %3295  ;;  %v4342_v11 = vadd.f32 %v4181_v63, %v2118_v61  ;;  %v1887_v16 = vadd.f32 1.0, %v3294_v52  ;;  %s2229_s29 = sshll.u32 %s3477_s8, 4  ;;  %s2230_s29 = int_to_ptr.vmem [resolvable:$true] %s2229_s29 }
 0x5ab   :  { %v3298_v12 = vpop.eup %3297  ;;  %v4345_v51 = vadd.f32 %v4184_v36, %v2121_v45  ;;  %v1886_v10 = vadd.f32 1.0, %v3296_v4  ;;  %s3443_s30 = scalar_lea.vmem %s2230_s29, 2048  ;;  %p3448_p11 = scmp.lt.s32.totalorder %s2230_s29, %s2230_s29 }
 0x5ac   :  { %v3300_v1 = vpop.eup %3299  ;;  %v2120_v0 = vmul.f32 %v3298_v12, %v4258_v42  ;;  %3307 = vrcp.f32 %v1887_v16  ;;  %p3444_p10 = scmp.ne.s32.totalorder %s2230_s29, %s3443_s30  ;;  %p3449_p12 = scmp.lt.s32.totalorder %s3443_s30, %s3443_s30 }
 0x5ad   :  { %v2123_v29 = vmul.f32 %v3300_v1, %v4266_v53  ;;  %3309 = vrcp.f32 %v1886_v10 }
 0x5ae   :  { %v4350_v28 = vadd.f32 %v4189_v26, %v2120_v0  ;;  %p3450_p13 = por %p3449_p12, %p3448_p11 }
 0x5af   :  { %v3302_v50 = vpop.eup %3301  ;;  %v4353_v63 = vadd.f32 %v4192_v57, %v2123_v29 }
 0x5b0   :  { %v3304_v19 = vpop.eup %3303  ;;  %v2122_v15 = vmul.f32 %v3302_v50, %v4268_v41  ;;  %p3451_p0 = pnand %p3450_p13, %p3444_p10 }
 0x5b1   :  { %v2125_v36 = vmul.f32 %v3304_v19, %v4276_v17 }
 0x5b2   :  { %v3306_v54 = vpop.eup %3305  ;;  %v4358_v8 = vadd.f32 %v4197_v25, %v2122_v15 }
 0x5b3   :  { %v4361_v42 = vadd.f32 %v4201_v39, %v2125_v36  ;;  %v2124_v53 = vmul.f32 %v3306_v54, %v4278_v6 }
 0x5b5   :  { %v4365_v26 = vadd.f32 %v4207_v30, %v2124_v53 }
 0x5b6   :  { %v3308_v49 = vpop.eup %3307 }
 0x5b7   :  { %v3310_v57 = vpop.eup %3309  ;;  %v2127_v38 = vmul.f32 %v3308_v49, %v4286_v7 }
 0x5b8   :  { %v2126_v41 = vmul.f32 %v3310_v57, %v4288_v34 }
 0x5b9   :  { %v4370_v17 = vadd.f32 %v4212_v48, %v2127_v38 }
 0x5ba   :  { %v4373_v25 = vadd.f32 %v4214_v32, %v2126_v41 }
 0x5e5   :  { %v4375_v9 = vpop.f32.mrb[32].mxu1 }
 0x5e6   :  { %v4377_v39 = vpop.f32.mrb[33].mxu1  ;;  %v1409_v30 = vmul.f32 %v4072_v37, %v4375_v9 }
 0x5e7   :  { %v1408_v6 = vmul.f32 %v4072_v37, %v4377_v39 }
 0x5e8   :  { %1554 = vadd.xlane.f32.xlu0 %v1409_v30 }
 0x5e9   :  { %1552 = vadd.xlane.f32.xlu1 %v1408_v6  ;;  %v4383_v7 = vpop.f32.mrb[34].mxu1 }
 0x5ea   :  { %v4385_v34 = vpop.f32.mrb[35].mxu1  ;;  %v1411_v48 = vmul.f32 %v4072_v37, %v4383_v7 }
 0x5eb   :  { %v1410_v32 = vmul.f32 %v4072_v37, %v4385_v34 }
 0x5ec   :  { %1558 = vadd.xlane.f32.xlu0 %v1411_v48 }
 0x5ed   :  { %1556 = vadd.xlane.f32.xlu1 %v1410_v32  ;;  %v4391_v24 = vpop.f32.mrb[36].mxu1 }
 0x5ee   :  { %v4393_v14 = vpop.f32.mrb[37].mxu1  ;;  %v1413_v58 = vmul.f32 %v4072_v37, %v4391_v24 }
 0x5ef   :  { %v1412_v22 = vmul.f32 %v4072_v37, %v4393_v14 }
 0x5f0   :  { %1562 = vadd.xlane.f32.xlu0 %v1413_v58 }
 0x5f1   :  { %1560 = vadd.xlane.f32.xlu1 %v1412_v22  ;;  %v4399_v33 = vpop.f32.mrb[38].mxu1 }
 0x5f2   :  { %v4401_v35 = vpop.f32.mrb[39].mxu1  ;;  %v1415_v40 = vmul.f32 %v4072_v37, %v4399_v33 }
 0x5f3   :  { %v1414_v60 = vmul.f32 %v4072_v37, %v4401_v35 }
 0x5f4   :  { %1566 = vadd.xlane.f32.xlu0 %v1415_v40 }
 0x5f5   :  { %1564 = vadd.xlane.f32.xlu1 %v1414_v60  ;;  %v4407_v62 = vpop.f32.mrb[40].mxu1 }
 0x5f6   :  { %v4409_v18 = vpop.f32.mrb[41].mxu1  ;;  %v1417_v3 = vmul.f32 %v4072_v37, %v4407_v62 }
 0x5f7   :  { %v1416_v46 = vmul.f32 %v4072_v37, %v4409_v18 }
 0x5f8   :  { %1570 = vadd.xlane.f32.xlu0 %v1417_v3 }
 0x5f9   :  { %1568 = vadd.xlane.f32.xlu1 %v1416_v46  ;;  %v4415_v2 = vpop.f32.mrb[42].mxu1 }
 0x5fa   :  { %v4417_v31 = vpop.f32.mrb[43].mxu1  ;;  %v1419_v55 = vmul.f32 %v4072_v37, %v4415_v2 }
 0x5fb   :  { %v1418_v13 = vmul.f32 %v4072_v37, %v4417_v31 }
 0x5fc   :  { %1574 = vadd.xlane.f32.xlu0 %v1419_v55 }
 0x5fd   :  { %1572 = vadd.xlane.f32.xlu1 %v1418_v13  ;;  %v4423_v43 = vpop.f32.mrb[44].mxu1 }
 0x5fe   :  { %v4425_v21 = vpop.f32.mrb[45].mxu1  ;;  %v1421_v61 = vmul.f32 %v3376_v47, %v4423_v43 }
 0x5ff   :  { %v1420_v52 = vmul.f32 %v3376_v47, %v4425_v21 }
 0x600   :  { %1578 = vadd.xlane.f32.xlu0 %v1421_v61 }
 0x601   :  { %1576 = vadd.xlane.f32.xlu1 %v1420_v52  ;;  %v4432_v45 = vpop.f32.mrb[46].mxu1 }
 0x602   :  { %v4434_v4 = vpop.f32.mrb[47].mxu1  ;;  %v1423_v37 = vmul.f32 %v3376_v47, %v4432_v45 }
 0x603   :  { %v1422_v16 = vmul.f32 %v3376_v47, %v4434_v4 }
 0x604   :  { %1582 = vadd.xlane.f32.xlu0 %v1423_v37 }
 0x605   :  { %1580 = vadd.xlane.f32.xlu1 %v1422_v16 }
 0x675   :  { %v1555_v12 = vpop.xlane.xlu0 %1554 }
 0x676   :  { %v2311_v10 = vmul.f32 -1.442695, %v1555_v12  ;;  %v1553_v1 = vpop.xlane.xlu1 %1552 }
 0x677   :  { %v2310_v0 = vmul.f32 -1.442695, %v1553_v1 }
 0x678   :  { %3311 = vpow2.f32 %v2311_v10 }
 0x679   :  { %3313 = vpow2.f32 %v2310_v0  ;;  %v1559_v29 = vpop.xlane.xlu0 %1558 }
 0x67a   :  { %v2313_v50 = vmul.f32 -1.442695, %v1559_v29  ;;  %v1557_v19 = vpop.xlane.xlu1 %1556 }
 0x67b   :  { %v2312_v15 = vmul.f32 -1.442695, %v1557_v19 }
 0x67c   :  { %3315 = vpow2.f32 %v2313_v50 }
 0x67d   :  { %3317 = vpow2.f32 %v2312_v15  ;;  %v1563_v36 = vpop.xlane.xlu0 %1562 }
 0x67e   :  { %v2315_v54 = vmul.f32 -1.442695, %v1563_v36  ;;  %v1561_v53 = vpop.xlane.xlu1 %1560 }
 0x67f   :  { %v2314_v49 = vmul.f32 -1.442695, %v1561_v53 }
 0x680   :  { %3319 = vpow2.f32 %v2315_v54 }
 0x681   :  { %3321 = vpow2.f32 %v2314_v49  ;;  %v1567_v57 = vpop.xlane.xlu0 %1566 }
 0x682   :  { %v3312_v38 = vpop.eup %3311  ;;  %v2317_v41 = vmul.f32 -1.442695, %v1567_v57  ;;  %v1565_v30 = vpop.xlane.xlu1 %1564 }
 0x683   :  { %v3314_v6 = vpop.eup %3313  ;;  %v1889_v48 = vadd.f32 1.0, %v3312_v38  ;;  %v2316_v32 = vmul.f32 -1.442695, %v1565_v30 }
 0x684   :  { %v1888_v58 = vadd.f32 1.0, %v3314_v6  ;;  %3323 = vpow2.f32 %v2317_v41 }
 0x685   :  { %3325 = vrcp.f32 %v1889_v48  ;;  %v1571_v22 = vpop.xlane.xlu0 %1570 }
 0x686   :  { %v3316_v40 = vpop.eup %3315  ;;  %3327 = vrcp.f32 %v1888_v58  ;;  %v2319_v60 = vmul.f32 -1.442695, %v1571_v22  ;;  %v1569_v3 = vpop.xlane.xlu1 %1568 }
 0x687   :  { %v3318_v46 = vpop.eup %3317  ;;  %v1891_v55 = vadd.f32 1.0, %v3316_v40  ;;  %3329 = vpow2.f32 %v2316_v32  ;;  %v2318_v13 = vmul.f32 -1.442695, %v1569_v3 }
 0x688   :  { %v1890_v47 = vadd.f32 1.0, %v3318_v46  ;;  %3331 = vpow2.f32 %v2319_v60 }
 0x689   :  { %3333 = vrcp.f32 %v1891_v55  ;;  %v1575_v61 = vpop.xlane.xlu0 %1574 }
 0x68a   :  { %v3320_v52 = vpop.eup %3319  ;;  %3335 = vrcp.f32 %v1890_v47  ;;  %v2321_v37 = vmul.f32 -1.442695, %v1575_v61  ;;  %v1573_v16 = vpop.xlane.xlu1 %1572 }
 0x68b   :  { %v3322_v12 = vpop.eup %3321  ;;  %v1893_v10 = vadd.f32 1.0, %v3320_v52  ;;  %3337 = vpow2.f32 %v2318_v13  ;;  %v2320_v1 = vmul.f32 -1.442695, %v1573_v16 }
 0x68c   :  { %v1892_v0 = vadd.f32 1.0, %v3322_v12  ;;  %3339 = vpow2.f32 %v2321_v37 }
 0x68d   :  { %3341 = vrcp.f32 %v1893_v10  ;;  %v1579_v29 = vpop.xlane.xlu0 %1578 }
 0x68e   :  { %v3324_v50 = vpop.eup %3323  ;;  %3343 = vrcp.f32 %v1892_v0  ;;  %v2323_v19 = vmul.f32 -1.442695, %v1579_v29  ;;  %v1577_v15 = vpop.xlane.xlu1 %1576 }
 0x68f   :  { %v3326_v36 = vpop.eup %3325  ;;  %v1895_v54 = vadd.f32 1.0, %v3324_v50  ;;  %3345 = vpow2.f32 %v2320_v1  ;;  %v2322_v53 = vmul.f32 -1.442695, %v1577_v15 }
 0x690   :  { %v3328_v49 = vpop.eup %3327  ;;  %v2129_v57 = vmul.f32 %v3326_v36, %v4375_v9  ;;  %3347 = vpow2.f32 %v2323_v19 }
 0x691   :  { %v3330_v38 = vpop.eup %3329  ;;  %v2128_v41 = vmul.f32 %v3328_v49, %v4377_v39  ;;  %3349 = vrcp.f32 %v1895_v54  ;;  %v1583_v30 = vpop.xlane.xlu0 %1582 }
 0x692   :  { %v3332_v6 = vpop.eup %3331  ;;  %v2151_v48 = vadd.f32 %v4314_v23, %v2129_v57  ;;  %v1894_v32 = vadd.f32 1.0, %v3330_v38  ;;  %3351 = vpow2.f32 %v2322_v53  ;;  %v2325_v58 = vmul.f32 -1.442695, %v1583_v30  ;;  %v1581_v22 = vpop.xlane.xlu1 %1580 }
 0x693   :  { %v3334_v40 = vpop.eup %3333  ;;  %v2147_v60 = vadd.f32 %v4317_v59, %v2128_v41  ;;  %v1897_v3 = vadd.f32 1.0, %v3332_v6  ;;  %v2324_v46 = vmul.f32 -1.442695, %v1581_v22 }
 0x694   :  { %v3336_v55 = vpop.eup %3335  ;;  %2209 = vst [vmem:[#allocation9 + $0x8] sm:$0xff] %v2151_v48  ;;  %v2131_v9 = vmul.f32 %v3334_v40, %v4383_v7  ;;  %3353 = vrcp.f32 %v1894_v32 }
 0x695   :  { %v3338_v39 = vpop.eup %3337  ;;  %2208 = vst [vmem:[#allocation9] sm:$0xff] %v2147_v60  ;;  %v2130_v13 = vmul.f32 %v3336_v55, %v4385_v34  ;;  %3355 = vrcp.f32 %v1897_v3 }
 0x696   :  { %v3340_v23 = vpop.eup %3339  ;;  %v2159_v47 = vadd.f32 %v4322_v20, %v2131_v9  ;;  %v1896_v61 = vadd.f32 1.0, %v3338_v39  ;;  %3357 = vpow2.f32 %v2325_v58 }
 0x697   :  { %v3342_v52 = vpop.eup %3341  ;;  %v2155_v59 = vadd.f32 %v4325_v27, %v2130_v13  ;;  %v1899_v37 = vadd.f32 1.0, %v3340_v23  ;;  %3359 = vpow2.f32 %v2324_v46 }
 0x698   :  { %v3344_v16 = vpop.eup %3343  ;;  %2211 = vst [vmem:[#allocation9 + $0x18] sm:$0xff] %v2159_v47  ;;  %v2133_v7 = vmul.f32 %v3342_v52, %v4391_v24  ;;  %3361 = vrcp.f32 %v1896_v61 }
 0x699   :  { %v3346_v12 = vpop.eup %3345  ;;  %2210 = vst [vmem:[#allocation9 + $0x10] sm:$0xff] %v2155_v59  ;;  %v2132_v34 = vmul.f32 %v3344_v16, %v4393_v14  ;;  %3363 = vrcp.f32 %v1899_v37 }
 0x69a   :  { %v3348_v10 = vpop.eup %3347  ;;  %v2167_v20 = vadd.f32 %v4330_v44, %v2133_v7  ;;  %v1898_v1 = vadd.f32 1.0, %v3346_v12 }
 0x69b   :  { %v3350_v0 = vpop.eup %3349  ;;  %v2163_v29 = vadd.f32 %v4333_v56, %v2132_v34  ;;  %v1901_v27 = vadd.f32 1.0, %v3348_v10 }
 0x69c   :  { %v3352_v50 = vpop.eup %3351  ;;  %2213 = vst [vmem:[#allocation9 + $0x28] sm:$0xff] %v2167_v20  ;;  %v2135_v19 = vmul.f32 %v3350_v0, %v4399_v33  ;;  %3365 = vrcp.f32 %v1898_v1 }
 0x69d   :  { %2212 = vst [vmem:[#allocation9 + $0x20] sm:$0xff] %v2163_v29  ;;  %3367 = vrcp.f32 %v1901_v27  ;;  %v1900_v24 = vadd.f32 1.0, %v3352_v50 }
 0x69e   :  { %v3354_v15 = vpop.eup %3353  ;;  %v2175_v14 = vadd.f32 %v4337_v5, %v2135_v19 }
 0x69f   :  { %v3356_v36 = vpop.eup %3355  ;;  %v2134_v54 = vmul.f32 %v3354_v15, %v4401_v35  ;;  %3369 = vrcp.f32 %v1900_v24 }
 0x6a0   :  { %v3358_v44 = vpop.eup %3357  ;;  %2215 = vst [vmem:[#allocation9 + $0x38] sm:$0xff] %v2175_v14  ;;  %v2137_v56 = vmul.f32 %v3356_v36, %v4407_v62 }
 0x6a1   :  { %v3360_v53 = vpop.eup %3359  ;;  %v2171_v49 = vadd.f32 %v4342_v11, %v2134_v54  ;;  %v1903_v57 = vadd.f32 1.0, %v3358_v44 }
 0x6a2   :  { %v3362_v33 = vpop.eup %3361  ;;  %v2183_v38 = vadd.f32 %v4345_v51, %v2137_v56  ;;  %v1902_v41 = vadd.f32 1.0, %v3360_v53 }
 0x6a3   :  { %v3364_v30 = vpop.eup %3363  ;;  %2214 = vst [vmem:[#allocation9 + $0x30] sm:$0xff] %v2171_v49  ;;  %v2136_v5 = vmul.f32 %v3362_v33, %v4409_v18  ;;  %3371 = vrcp.f32 %v1903_v57 }
 0x6a4   :  { %2217 = vst [vmem:[#allocation9 + $0x48] sm:$0xff] %v2183_v38  ;;  %v2139_v35 = vmul.f32 %v3364_v30, %v4415_v2  ;;  %3373 = vrcp.f32 %v1902_v41 }
 0x6a5   :  { %v2179_v6 = vadd.f32 %v4350_v28, %v2136_v5 }
 0x6a6   :  { %v3366_v62 = vpop.eup %3365  ;;  %v2191_v48 = vadd.f32 %v4353_v63, %v2139_v35 }
 0x6a7   :  { %v3368_v11 = vpop.eup %3367  ;;  %2216 = vst [vmem:[#allocation9 + $0x40] sm:$0xff] %v2179_v6  ;;  %v2138_v32 = vmul.f32 %v3366_v62, %v4417_v31 }
 0x6a8   :  { %2219 = vst [vmem:[#allocation9 + $0x58] sm:$0xff] %v2191_v48  ;;  %v2141_v51 = vmul.f32 %v3368_v11, %v4423_v43 }
 0x6a9   :  { %v3370_v58 = vpop.eup %3369  ;;  %v2187_v18 = vadd.f32 %v4358_v8, %v2138_v32 }
 0x6aa   :  { %v2199_v22 = vadd.f32 %v4361_v42, %v2141_v51  ;;  %v2140_v2 = vmul.f32 %v3370_v58, %v4425_v21 }
 0x6ab   :  { %2218 = vst [vmem:[#allocation9 + $0x50] sm:$0xff] %v2187_v18 }
 0x6ac   :  { %2221 = vst [vmem:[#allocation9 + $0x68] sm:$0xff] %v2199_v22  ;;  %v2195_v28 = vadd.f32 %v4365_v26, %v2140_v2 }
 0x6ad   :  { %v3372_v40 = vpop.eup %3371 }
 0x6ae   :  { %v3374_v63 = vpop.eup %3373  ;;  %2220 = vst [vmem:[#allocation9 + $0x60] sm:$0xff] %v2195_v28  ;;  %v2143_v60 = vmul.f32 %v3372_v40, %v4432_v45 }
 0x6af   :  { %v2142_v31 = vmul.f32 %v3374_v63, %v4434_v4 }
 0x6b0   :  { %v2207_v43 = vadd.f32 %v4370_v17, %v2143_v60 }
 0x6b1   :  { %v2203_v8 = vadd.f32 %v4373_v25, %v2142_v31 }
 0x6b2   :  { %2223 = vst [vmem:[#allocation9 + $0x78] sm:$0xff] %v2207_v43 }
 0x6b3   :  { %2222 = vst [vmem:[#allocation9 + $0x70] sm:$0xff] %v2203_v8 }
 0x6b4   :  { %3454 = shalt.err (!%p3451_p0)
}
 0x6b5   :  { %s3455_s3 = scalar_lea.hbm %s4494_s9, 2048 }
 0x6b6   :  { %p3456_p1 = scmp.ne.s32.totalorder %s4494_s9, %s3455_s3  ;;  %p3459_p2 = scmp.lt.u32.totalorder %s3455_s3, %s4494_s9 }
 0x6b8   :  { %p3461_p3 = pnand %p3459_p2, %p3456_p1 }
 0x6ba   :  { %3464 = shalt.err (!%p3461_p3)
}
 0x6bb   :  { %2235 = dma.vmem_to_hbm [thread:$0]  %s2230_s29, 2048, %s4494_s9, [#allocation5], %s3473_s21, %s3473_s21, %s3474_s22  }
 0x6bc   :  { %3469 = dma.done.wait [#allocation5], 2048  }
 0x6bd   :  { %3470 = vsyncadd [#allocation5], 4294965248 }
 0x6be   :  { %2239 = vsyncpa [#allocation4], 1 }
 0x6bf   :  { %2240 = vsyncpa [#allocation7], 1 }
 0x6c0   :  { %2241 = vsyncpa [#allocation5], 1 }

</bundles_post_ra>
